<compile_context>
chip_gen: v7x
topology: tpu7x:2x2x1
jax: 0.10.0
libtpu: 0.0.40
codegen_flags: <defaults>
</compile_context>

<pallas_src>
import math
from functools import partial

import jax
import jax.numpy as jnp
from jax.experimental import pallas as pl
from jax.experimental.pallas import tpu as pltpu

LEAKY_SLOPE = 0.01  # nn.LeakyReLU default negative_slope

# categorical cardinalities from the reference module
C2 = [2, 7, 2, 2, 3]      # columns 10:15  -> 16 one-hot dims
C3 = [11, 3, 2, 10, 5]    # columns 15:20  -> 31 one-hot dims
IN_DIM = 10 + sum(C2) + sum(C3)   # = 57
HIDDENS = [256, 600, 256, 128, 64]
OUT_DIM = 2

# lane-dense (multiple-of-128) padded layer widths; 256/128/64 stay as-is
IN_PAD, H2_PAD, OUT_PAD = 128, 640, 128
DIMS_TRUE = [IN_DIM] + HIDDENS + [OUT_DIM]             # 57,256,600,256,128,64,2
DIMS_PAD = [IN_PAD, 256, H2_PAD, 256, 128, 64, OUT_PAD]

MAX_TILE_B = 1024  # big tiles amortize per-step overhead on v5e/v6e


def _round_up(v, m):
    return -(-v // m) * m


def _leaky(v):
    return jnp.where(v > 0, v, LEAKY_SLOPE * v)


def _mlp_kernel(x_ref, noise_ref,
                w1, b1, w2, b2, w3, b3, w4, b4, w5, b5, w6, b6,
                out_ref):
    """Fused 6-layer MLP with additive noise after layer2.

    x_ref:     (tile_b, 128)  bf16 (encoded + padded input)
    noise_ref: (tile_b, 640)  bf16 (pre-scaled Gaussian noise)
    w*, b*:    bf16 weights / f32 biases, zero-padded to lane-dense dims
    out_ref:   (tile_b, 128)  bf16 (only lanes 0:2 meaningful)
    """

    def layer(h_bf16, w_ref, b_ref):
        # bf16 operands on the MXU, f32 accumulation; bias-add + LeakyReLU in f32
        z = jnp.dot(h_bf16, w_ref[...], preferred_element_type=jnp.float32)
        return _leaky(z + b_ref[...])

    h = layer(x_ref[...], w1, b1).astype(jnp.bfloat16)           # (tb, 256)
    h = layer(h, w2, b2)                                          # (tb, 640) f32
    # additive Gaussian noise (padded lanes 600:640 also get noise but are
    # killed by w3's zero rows)
    h = (h + noise_ref[...].astype(jnp.float32)).astype(jnp.bfloat16)
    h = layer(h, w3, b3).astype(jnp.bfloat16)                     # (tb, 256)
    h = layer(h, w4, b4).astype(jnp.bfloat16)                     # (tb, 128)
    h = layer(h, w5, b5).astype(jnp.bfloat16)                     # (tb, 64)
    z = jnp.dot(h, w6[...], preferred_element_type=jnp.float32) + b6[...]
    out_ref[...] = z.astype(jnp.bfloat16)


def init_params(key):
    """PyTorch-Linear-style init (uniform +-1/sqrt(fan_in)) at the TRUE dims."""
    params = []
    for i in range(len(DIMS_TRUE) - 1):
        fan_in, fan_out = DIMS_TRUE[i], DIMS_TRUE[i + 1]
        key, kw, kb = jax.random.split(key, 3)
        bound = 1.0 / math.sqrt(fan_in)
        w = jax.random.uniform(kw, (fan_in, fan_out), jnp.float32, -bound, bound)
        b = jax.random.uniform(kb, (1, fan_out), jnp.float32, -bound, bound)
        params += [w, b]
    return params


def pad_params(params):
    """Zero-pad to lane-dense dims; weights -> bf16 (halved DMA), biases -> f32."""
    padded = []
    for i in range(6):
        w, b = params[2 * i], params[2 * i + 1]
        ri, ro = DIMS_PAD[i], DIMS_PAD[i + 1]
        wp = jnp.zeros((ri, ro), jnp.bfloat16)
        wp = wp.at[: w.shape[0], : w.shape[1]].set(w.astype(jnp.bfloat16))
        bp = jnp.zeros((1, ro), jnp.float32).at[:, : b.shape[1]].set(b)
        padded += [wp, bp]
    return tuple(padded)


def encode_input(x):
    """Scatter-style one-hot of the categorical columns, padded 57 -> 128."""
    X1 = x[:, :10]
    X2 = (x[:, 10:15] - 1.0).astype(jnp.int32)
    X3 = (x[:, 15:20] - 1.0).astype(jnp.int32)
    pieces = [X1]
    # NOTE: out-of-range category values yield all-zero rows (torch scatter
    # would error instead) -- only diverges on invalid input.
    for i, c in enumerate(C2):
        pieces.append(jax.nn.one_hot(X2[:, i], c, dtype=jnp.float32))
    for i, c in enumerate(C3):
        pieces.append(jax.nn.one_hot(X3[:, i], c, dtype=jnp.float32))
    x57 = jnp.concatenate(pieces, axis=1)                  # (B, 57)
    return jnp.pad(x57, ((0, 0), (0, IN_PAD - IN_DIM)))    # (B, 128)


def _pick_tile(B):
    """Multiple of 16 (bf16 packing); >= 2 grid steps once B >= 32 (v7x 2 TCs)."""
    B16 = _round_up(B, 16)
    if B16 >= 32:
        tile_b = min(MAX_TILE_B, _round_up(-(-B16 // 2), 16))
    else:
        tile_b = B16
    Bp = _round_up(B16, tile_b)
    return tile_b, Bp


@partial(jax.jit, static_argnames=("noise_scale",))
def _forward_jit(x, noise_key, padded_params, *, noise_scale):
    xp = encode_input(x).astype(jnp.bfloat16)     # (B, 128) bf16, lane-dense
    B = xp.shape[0]
    tile_b, Bp = _pick_tile(B)
    if Bp != B:
        xp = jnp.pad(xp, ((0, Bp - B), (0, 0)))

    # std = sqrt(noise_scale), matching np.random.normal(0, sqrt(noise_scale), ...)
    noise = (jax.random.normal(noise_key, (Bp, H2_PAD), jnp.float32)
             * math.sqrt(noise_scale)).astype(jnp.bfloat16)

    flops = 2 * Bp * sum(DIMS_PAD[i] * DIMS_PAD[i + 1] for i in range(6))
    weight_bytes = sum(int(p.size) * p.dtype.itemsize for p in padded_params)
    bytes_accessed = int(weight_bytes
                         + Bp * IN_PAD * 2       # bf16 input
                         + Bp * H2_PAD * 2       # bf16 noise
                         + Bp * OUT_PAD * 2)     # bf16 output

    out = pl.pallas_call(
        _mlp_kernel,
        out_shape=jax.ShapeDtypeStruct((Bp, OUT_PAD), jnp.bfloat16),
        grid=(Bp // tile_b,),
        in_specs=[pl.BlockSpec((tile_b, IN_PAD), lambda i: (i, 0)),
                  pl.BlockSpec((tile_b, H2_PAD), lambda i: (i, 0))]
                 + [pl.BlockSpec(p.shape, lambda i: (0, 0))
                    for p in padded_params],
        out_specs=pl.BlockSpec((tile_b, OUT_PAD), lambda i: (i, 0)),
        compiler_params=pltpu.CompilerParams(
            dimension_semantics=("parallel",),
            vmem_limit_bytes=64 * 1024 * 1024),
        cost_estimate=pl.CostEstimate(
            flops=flops, transcendentals=0, bytes_accessed=bytes_accessed),
    )(xp, noise, *padded_params)

    return out[:B, :OUT_DIM].astype(jnp.float32)


def client_forward(x, noise_scale, padded_params, noise_key, check_nan=False):
    if check_nan:
        # TODO(synk): host-side NaN check (mirrors the torch ValueError) forces a
        # device sync before dispatch; kept opt-in to avoid serializing every call.
        import numpy as np
        if bool(np.isnan(np.asarray(jax.device_get(x))).any()):
            raise ValueError("NaN detected in input")
    return _forward_jit(x, noise_key, tuple(padded_params),
                        noise_scale=float(noise_scale))


if __name__ == "__main__":
    key = jax.random.PRNGKey(0)
    k_params, k_cont, k_cat2, k_cat3, k_noise = jax.random.split(key, 5)

    B = 8
    # 10 continuous features
    x_cont = jax.random.normal(k_cont, (B, 10), jnp.float32)
    # 5 categorical features with cardinalities C2, values in 1..c (as floats)
    x_cat2 = jnp.stack(
        [jax.random.randint(jax.random.fold_in(k_cat2, i), (B,), 1, c + 1)
         for i, c in enumerate(C2)], axis=1).astype(jnp.float32)
    # 5 categorical features with cardinalities C3, values in 1..c (as floats)
    x_cat3 = jnp.stack(
        [jax.random.randint(jax.random.fold_in(k_cat3, i), (B,), 1, c + 1)
         for i, c in enumerate(C3)], axis=1).astype(jnp.float32)
    x = jnp.concatenate([x_cont, x_cat2, x_cat3], axis=1)  # (B, 20)

    params = init_params(k_params)
    padded_params = pad_params(params)
    noise_scale = 0.01

    out = client_forward(x, noise_scale, padded_params, k_noise)
    out = jax.block_until_ready(out)
    assert out.shape == (B, OUT_DIM) and out.dtype == jnp.float32
    print("KERNEL_OK")
</pallas_src>

<mosaic_0001>
module attributes {stable_mosaic.version = 11 : i64} {
  func.func @_mlp_kernel(%arg0: i32, %arg1: memref<16x128xbf16, #tpu.memory_space<vmem>>, %arg2: memref<16x640xbf16, #tpu.memory_space<vmem>>, %arg3: memref<128x256xbf16, #tpu.memory_space<vmem>>, %arg4: memref<1x256xf32, #tpu.memory_space<vmem>>, %arg5: memref<256x640xbf16, #tpu.memory_space<vmem>>, %arg6: memref<1x640xf32, #tpu.memory_space<vmem>>, %arg7: memref<640x256xbf16, #tpu.memory_space<vmem>>, %arg8: memref<1x256xf32, #tpu.memory_space<vmem>>, %arg9: memref<256x128xbf16, #tpu.memory_space<vmem>>, %arg10: memref<1x128xf32, #tpu.memory_space<vmem>>, %arg11: memref<128x64xbf16, #tpu.memory_space<vmem>>, %arg12: memref<1x64xf32, #tpu.memory_space<vmem>>, %arg13: memref<64x128xbf16, #tpu.memory_space<vmem>>, %arg14: memref<1x128xf32, #tpu.memory_space<vmem>>, %arg15: memref<16x128xbf16, #tpu.memory_space<vmem>>) attributes {dimension_semantics = [#tpu.dimension_semantics<parallel>], iteration_bounds = array<i64: 1>, scalar_prefetch = 0 : i64, scratch_operands = 0 : i64, tpu.core_type = #tpu.core_type<tc>, window_params = [{transform_indices = @transform_0, window_bounds = array<i64: 16, 128>}, {transform_indices = @transform_1, window_bounds = array<i64: 16, 640>}, {pipeline_mode = #tpu.pipeline_mode<synchronous>, transform_indices = @transform_2, window_bounds = array<i64: 128, 256>}, {pipeline_mode = #tpu.pipeline_mode<synchronous>, transform_indices = @transform_3, window_bounds = array<i64: 1, 256>}, {pipeline_mode = #tpu.pipeline_mode<synchronous>, transform_indices = @transform_4, window_bounds = array<i64: 256, 640>}, {pipeline_mode = #tpu.pipeline_mode<synchronous>, transform_indices = @transform_5, window_bounds = array<i64: 1, 640>}, {pipeline_mode = #tpu.pipeline_mode<synchronous>, transform_indices = @transform_6, window_bounds = array<i64: 640, 256>}, {pipeline_mode = #tpu.pipeline_mode<synchronous>, transform_indices = @transform_7, window_bounds = array<i64: 1, 256>}, {pipeline_mode = #tpu.pipeline_mode<synchronous>, transform_indices = @transform_8, window_bounds = array<i64: 256, 128>}, {pipeline_mode = #tpu.pipeline_mode<synchronous>, transform_indices = @transform_9, window_bounds = array<i64: 1, 128>}, {pipeline_mode = #tpu.pipeline_mode<synchronous>, transform_indices = @transform_10, window_bounds = array<i64: 128, 64>}, {pipeline_mode = #tpu.pipeline_mode<synchronous>, transform_indices = @transform_11, window_bounds = array<i64: 1, 64>}, {pipeline_mode = #tpu.pipeline_mode<synchronous>, transform_indices = @transform_12, window_bounds = array<i64: 64, 128>}, {pipeline_mode = #tpu.pipeline_mode<synchronous>, transform_indices = @transform_13, window_bounds = array<i64: 1, 128>}, {transform_indices = @transform_14, window_bounds = array<i64: 16, 128>}]} {
    %c0 = arith.constant 0 : index
    %c0_0 = arith.constant 0 : index
    %0 = vector.load %arg1[%c0, %c0_0] : memref<16x128xbf16, #tpu.memory_space<vmem>>, vector<16x128xbf16>
    %c0_1 = arith.constant 0 : index
    %c0_2 = arith.constant 0 : index
    %1 = vector.load %arg3[%c0_1, %c0_2] : memref<128x256xbf16, #tpu.memory_space<vmem>>, vector<128x256xbf16>
    %cst = arith.constant dense<0.000000e+00> : vector<16x256xf32>
    %2 = tpu.matmul %0, %1, %cst {dimension_numbers = #tpu.dot_dimension_numbers<[1], [0], [0], [1], [0, 0, 1, 1], [], []>} : vector<16x128xbf16>, vector<128x256xbf16>, vector<16x256xf32> -> vector<16x256xf32>
    %c0_3 = arith.constant 0 : index
    %c0_4 = arith.constant 0 : index
    %3 = vector.load %arg4[%c0_3, %c0_4] : memref<1x256xf32, #tpu.memory_space<vmem>>, vector<1x256xf32>
    %4 = vector.broadcast %3 : vector<1x256xf32> to vector<16x256xf32>
    %5 = arith.addf %2, %4 : vector<16x256xf32>
    %cst_5 = arith.constant 0.000000e+00 : f32
    %6 = vector.broadcast %cst_5 : f32 to vector<16x256xf32>
    %7 = arith.cmpf ogt, %5, %6 : vector<16x256xf32>
    %cst_6 = arith.constant 0.00999999977 : f32
    %8 = vector.broadcast %cst_6 : f32 to vector<16x256xf32>
    %9 = arith.mulf %8, %5 : vector<16x256xf32>
    %10 = arith.select %7, %5, %9 : vector<16x256xi1>, vector<16x256xf32>
    %11 = arith.truncf %10 : vector<16x256xf32> to vector<16x256xbf16>
    %c0_7 = arith.constant 0 : index
    %c0_8 = arith.constant 0 : index
    %12 = vector.load %arg5[%c0_7, %c0_8] : memref<256x640xbf16, #tpu.memory_space<vmem>>, vector<256x640xbf16>
    %cst_9 = arith.constant dense<0.000000e+00> : vector<16x640xf32>
    %13 = tpu.matmul %11, %12, %cst_9 {dimension_numbers = #tpu.dot_dimension_numbers<[1], [0], [0], [1], [0, 0, 1, 1], [], []>} : vector<16x256xbf16>, vector<256x640xbf16>, vector<16x640xf32> -> vector<16x640xf32>
    %c0_10 = arith.constant 0 : index
    %c0_11 = arith.constant 0 : index
    %14 = vector.load %arg6[%c0_10, %c0_11] : memref<1x640xf32, #tpu.memory_space<vmem>>, vector<1x640xf32>
    %15 = vector.broadcast %14 : vector<1x640xf32> to vector<16x640xf32>
    %16 = arith.addf %13, %15 : vector<16x640xf32>
    %cst_12 = arith.constant 0.000000e+00 : f32
    %17 = vector.broadcast %cst_12 : f32 to vector<16x640xf32>
    %18 = arith.cmpf ogt, %16, %17 : vector<16x640xf32>
    %cst_13 = arith.constant 0.00999999977 : f32
    %19 = vector.broadcast %cst_13 : f32 to vector<16x640xf32>
    %20 = arith.mulf %19, %16 : vector<16x640xf32>
    %21 = arith.select %18, %16, %20 : vector<16x640xi1>, vector<16x640xf32>
    %c0_14 = arith.constant 0 : index
    %c0_15 = arith.constant 0 : index
    %22 = vector.load %arg2[%c0_14, %c0_15] : memref<16x640xbf16, #tpu.memory_space<vmem>>, vector<16x640xbf16>
    %23 = arith.extf %22 : vector<16x640xbf16> to vector<16x640xf32>
    %24 = arith.addf %21, %23 : vector<16x640xf32>
    %25 = arith.truncf %24 : vector<16x640xf32> to vector<16x640xbf16>
    %c0_16 = arith.constant 0 : index
    %c0_17 = arith.constant 0 : index
    %26 = vector.load %arg7[%c0_16, %c0_17] : memref<640x256xbf16, #tpu.memory_space<vmem>>, vector<640x256xbf16>
    %cst_18 = arith.constant dense<0.000000e+00> : vector<16x256xf32>
    %27 = tpu.matmul %25, %26, %cst_18 {dimension_numbers = #tpu.dot_dimension_numbers<[1], [0], [0], [1], [0, 0, 1, 1], [], []>} : vector<16x640xbf16>, vector<640x256xbf16>, vector<16x256xf32> -> vector<16x256xf32>
    %c0_19 = arith.constant 0 : index
    %c0_20 = arith.constant 0 : index
    %28 = vector.load %arg8[%c0_19, %c0_20] : memref<1x256xf32, #tpu.memory_space<vmem>>, vector<1x256xf32>
    %29 = vector.broadcast %28 : vector<1x256xf32> to vector<16x256xf32>
    %30 = arith.addf %27, %29 : vector<16x256xf32>
    %cst_21 = arith.constant 0.000000e+00 : f32
    %31 = vector.broadcast %cst_21 : f32 to vector<16x256xf32>
    %32 = arith.cmpf ogt, %30, %31 : vector<16x256xf32>
    %cst_22 = arith.constant 0.00999999977 : f32
    %33 = vector.broadcast %cst_22 : f32 to vector<16x256xf32>
    %34 = arith.mulf %33, %30 : vector<16x256xf32>
    %35 = arith.select %32, %30, %34 : vector<16x256xi1>, vector<16x256xf32>
    %36 = arith.truncf %35 : vector<16x256xf32> to vector<16x256xbf16>
    %c0_23 = arith.constant 0 : index
    %c0_24 = arith.constant 0 : index
    %37 = vector.load %arg9[%c0_23, %c0_24] : memref<256x128xbf16, #tpu.memory_space<vmem>>, vector<256x128xbf16>
    %cst_25 = arith.constant dense<0.000000e+00> : vector<16x128xf32>
    %38 = tpu.matmul %36, %37, %cst_25 {dimension_numbers = #tpu.dot_dimension_numbers<[1], [0], [0], [1], [0, 0, 1, 1], [], []>} : vector<16x256xbf16>, vector<256x128xbf16>, vector<16x128xf32> -> vector<16x128xf32>
    %c0_26 = arith.constant 0 : index
    %c0_27 = arith.constant 0 : index
    %39 = vector.load %arg10[%c0_26, %c0_27] : memref<1x128xf32, #tpu.memory_space<vmem>>, vector<1x128xf32>
    %40 = vector.broadcast %39 : vector<1x128xf32> to vector<16x128xf32>
    %41 = arith.addf %38, %40 : vector<16x128xf32>
    %cst_28 = arith.constant 0.000000e+00 : f32
    %42 = vector.broadcast %cst_28 : f32 to vector<16x128xf32>
    %43 = arith.cmpf ogt, %41, %42 : vector<16x128xf32>
    %cst_29 = arith.constant 0.00999999977 : f32
    %44 = vector.broadcast %cst_29 : f32 to vector<16x128xf32>
    %45 = arith.mulf %44, %41 : vector<16x128xf32>
    %46 = arith.select %43, %41, %45 : vector<16x128xi1>, vector<16x128xf32>
    %47 = arith.truncf %46 : vector<16x128xf32> to vector<16x128xbf16>
    %c0_30 = arith.constant 0 : index
    %c0_31 = arith.constant 0 : index
    %48 = vector.load %arg11[%c0_30, %c0_31] : memref<128x64xbf16, #tpu.memory_space<vmem>>, vector<128x64xbf16>
    %cst_32 = arith.constant dense<0.000000e+00> : vector<16x64xf32>
    %49 = tpu.matmul %47, %48, %cst_32 {dimension_numbers = #tpu.dot_dimension_numbers<[1], [0], [0], [1], [0, 0, 1, 1], [], []>} : vector<16x128xbf16>, vector<128x64xbf16>, vector<16x64xf32> -> vector<16x64xf32>
    %c0_33 = arith.constant 0 : index
    %c0_34 = arith.constant 0 : index
    %50 = vector.load %arg12[%c0_33, %c0_34] : memref<1x64xf32, #tpu.memory_space<vmem>>, vector<1x64xf32>
    %51 = vector.broadcast %50 : vector<1x64xf32> to vector<16x64xf32>
    %52 = arith.addf %49, %51 : vector<16x64xf32>
    %cst_35 = arith.constant 0.000000e+00 : f32
    %53 = vector.broadcast %cst_35 : f32 to vector<16x64xf32>
    %54 = arith.cmpf ogt, %52, %53 : vector<16x64xf32>
    %cst_36 = arith.constant 0.00999999977 : f32
    %55 = vector.broadcast %cst_36 : f32 to vector<16x64xf32>
    %56 = arith.mulf %55, %52 : vector<16x64xf32>
    %57 = arith.select %54, %52, %56 : vector<16x64xi1>, vector<16x64xf32>
    %58 = arith.truncf %57 : vector<16x64xf32> to vector<16x64xbf16>
    %c0_37 = arith.constant 0 : index
    %c0_38 = arith.constant 0 : index
    %59 = vector.load %arg13[%c0_37, %c0_38] : memref<64x128xbf16, #tpu.memory_space<vmem>>, vector<64x128xbf16>
    %cst_39 = arith.constant dense<0.000000e+00> : vector<16x128xf32>
    %60 = tpu.matmul %58, %59, %cst_39 {dimension_numbers = #tpu.dot_dimension_numbers<[1], [0], [0], [1], [0, 0, 1, 1], [], []>} : vector<16x64xbf16>, vector<64x128xbf16>, vector<16x128xf32> -> vector<16x128xf32>
    %c0_40 = arith.constant 0 : index
    %c0_41 = arith.constant 0 : index
    %61 = vector.load %arg14[%c0_40, %c0_41] : memref<1x128xf32, #tpu.memory_space<vmem>>, vector<1x128xf32>
    %62 = vector.broadcast %61 : vector<1x128xf32> to vector<16x128xf32>
    %63 = arith.addf %60, %62 : vector<16x128xf32>
    %64 = arith.truncf %63 : vector<16x128xf32> to vector<16x128xbf16>
    %c0_42 = arith.constant 0 : index
    %c0_43 = arith.constant 0 : index
    %65 = vector.load %arg15[%c0_42, %c0_43] : memref<16x128xbf16, #tpu.memory_space<vmem>>, vector<16x128xbf16>
    tpu.vector_store %arg15[%c0_42, %c0_43], %64 {strides = array<i32>} : memref<16x128xbf16, #tpu.memory_space<vmem>>, vector<16x128xbf16>,
    return
  }
  func.func @transform_0(%arg0: i32) -> (i32, i32) {
    %c0_i32 = arith.constant 0 : i32
    %c0_i32_0 = arith.constant 0 : i32
    return %arg0, %c0_i32 : i32, i32
  }
  func.func @transform_1(%arg0: i32) -> (i32, i32) {
    %c0_i32 = arith.constant 0 : i32
    %c0_i32_0 = arith.constant 0 : i32
    return %arg0, %c0_i32 : i32, i32
  }
  func.func @transform_2(%arg0: i32) -> (i32, i32) {
    %c0_i32 = arith.constant 0 : i32
    %c0_i32_0 = arith.constant 0 : i32
    %c0_i32_1 = arith.constant 0 : i32
    return %c0_i32, %c0_i32_0 : i32, i32
  }
  func.func @transform_3(%arg0: i32) -> (i32, i32) {
    %c0_i32 = arith.constant 0 : i32
    %c0_i32_0 = arith.constant 0 : i32
    %c0_i32_1 = arith.constant 0 : i32
    return %c0_i32, %c0_i32_0 : i32, i32
  }
  func.func @transform_4(%arg0: i32) -> (i32, i32) {
    %c0_i32 = arith.constant 0 : i32
    %c0_i32_0 = arith.constant 0 : i32
    %c0_i32_1 = arith.constant 0 : i32
    return %c0_i32, %c0_i32_0 : i32, i32
  }
  func.func @transform_5(%arg0: i32) -> (i32, i32) {
    %c0_i32 = arith.constant 0 : i32
    %c0_i32_0 = arith.constant 0 : i32
    %c0_i32_1 = arith.constant 0 : i32
    return %c0_i32, %c0_i32_0 : i32, i32
  }
  func.func @transform_6(%arg0: i32) -> (i32, i32) {
    %c0_i32 = arith.constant 0 : i32
    %c0_i32_0 = arith.constant 0 : i32
    %c0_i32_1 = arith.constant 0 : i32
    return %c0_i32, %c0_i32_0 : i32, i32
  }
  func.func @transform_7(%arg0: i32) -> (i32, i32) {
    %c0_i32 = arith.constant 0 : i32
    %c0_i32_0 = arith.constant 0 : i32
    %c0_i32_1 = arith.constant 0 : i32
    return %c0_i32, %c0_i32_0 : i32, i32
  }
  func.func @transform_8(%arg0: i32) -> (i32, i32) {
    %c0_i32 = arith.constant 0 : i32
    %c0_i32_0 = arith.constant 0 : i32
    %c0_i32_1 = arith.constant 0 : i32
    return %c0_i32, %c0_i32_0 : i32, i32
  }
  func.func @transform_9(%arg0: i32) -> (i32, i32) {
    %c0_i32 = arith.constant 0 : i32
    %c0_i32_0 = arith.constant 0 : i32
    %c0_i32_1 = arith.constant 0 : i32
    return %c0_i32, %c0_i32_0 : i32, i32
  }
  func.func @transform_10(%arg0: i32) -> (i32, i32) {
    %c0_i32 = arith.constant 0 : i32
    %c0_i32_0 = arith.constant 0 : i32
    %c0_i32_1 = arith.constant 0 : i32
    return %c0_i32, %c0_i32_0 : i32, i32
  }
  func.func @transform_11(%arg0: i32) -> (i32, i32) {
    %c0_i32 = arith.constant 0 : i32
    %c0_i32_0 = arith.constant 0 : i32
    %c0_i32_1 = arith.constant 0 : i32
    return %c0_i32, %c0_i32_0 : i32, i32
  }
  func.func @transform_12(%arg0: i32) -> (i32, i32) {
    %c0_i32 = arith.constant 0 : i32
    %c0_i32_0 = arith.constant 0 : i32
    %c0_i32_1 = arith.constant 0 : i32
    return %c0_i32, %c0_i32_0 : i32, i32
  }
  func.func @transform_13(%arg0: i32) -> (i32, i32) {
    %c0_i32 = arith.constant 0 : i32
    %c0_i32_0 = arith.constant 0 : i32
    %c0_i32_1 = arith.constant 0 : i32
    return %c0_i32, %c0_i32_0 : i32, i32
  }
  func.func @transform_14(%arg0: i32) -> (i32, i32) {
    %c0_i32 = arith.constant 0 : i32
    %c0_i32_0 = arith.constant 0 : i32
    return %arg0, %c0_i32 : i32, i32
  }
}

</mosaic_0001>

<bundles_post_ra>
// kernel: _forward_jit.1
= control target key start
LH: loop header
LB: loop body
LE: loop exit
PB: predicated region body
PF: predicated region fallthrough
CT: control target
= control target key end

     0   :  { %19 = vsyncpa [#allocation3], 0  ;;  %s3552_s0 = inlined_call_operand.hbm [shape: bf16[16,128], index: 0, kind: input, shape index: {}]   ;;  %s3553_s1 = inlined_call_operand.hbm [shape: bf16[16,640], index: 1, kind: input, shape index: {}]   ;;  %s3554_s2 = inlined_call_operand.hbm [shape: bf16[128,256], index: 2, kind: input, shape index: {}]   ;;  %s3555_s3 = inlined_call_operand.hbm [shape: f32[1,256], index: 3, kind: input, shape index: {}]   ;;  %s3556_s4 = inlined_call_operand.hbm [shape: bf16[256,640], index: 4, kind: input, shape index: {}]   ;;  %s3557_s5 = inlined_call_operand.hbm [shape: f32[1,640], index: 5, kind: input, shape index: {}]   ;;  %s3558_s6 = inlined_call_operand.hbm [shape: bf16[640,256], index: 6, kind: input, shape index: {}]   ;;  %s3559_s7 = inlined_call_operand.hbm [shape: f32[1,256], index: 7, kind: input, shape index: {}]   ;;  %s3560_s8 = inlined_call_operand.hbm [shape: bf16[256,128], index: 8, kind: input, shape index: {}]   ;;  %s3561_s9 = inlined_call_operand.hbm [shape: f32[1,128], index: 9, kind: input, shape index: {}]   ;;  %s3562_s10 = inlined_call_operand.hbm [shape: bf16[128,64], index: 10, kind: input, shape index: {}]   ;;  %s3563_s11 = inlined_call_operand.hbm [shape: f32[1,64], index: 11, kind: input, shape index: {}]   ;;  %s3564_s12 = inlined_call_operand.hbm [shape: bf16[64,128], index: 12, kind: input, shape index: {}]   ;;  %s3565_s13 = inlined_call_operand.hbm [shape: f32[1,128], index: 13, kind: input, shape index: {}]   ;;  %s3566_s14 = inlined_call_operand.hbm [shape: bf16[16,128], index: 14, kind: output, shape index: {}]  }
   0x1   :  { %20 = vsyncpa [#allocation6], 0 }
   0x2   :  { %21 = vsyncpa [#allocation9], 0 }
   0x3   :  { %22 = vsyncpa [#allocation12], 0 }
   0x4   :  { %23 = vsyncpa [#allocation15], 0 }
   0x5   :  { %24 = vsyncpa [#allocation18], 0 }
   0x6   :  { %25 = vsyncpa [#allocation21], 0 }
   0x7   :  { %26 = vsyncpa [#allocation24], 0 }
   0x8   :  { %27 = vsyncpa [#allocation4], 0  ;;  %s3159_s29 = smov [#allocation5]   ;;  %s2811_s17 = scalar_lea.hbm %s3553_s1, 640 }
   0x9   :  { %s45_s30 = sshll.u32 %s3159_s29, 4  ;;  %p2812_p0 = scmp.ne.s32.totalorder %s3553_s1, %s2811_s17  ;;  %s46_s30 = int_to_ptr.vmem [resolvable:$true] %s45_s30 }
   0xa   :  { %p2815_p1 = scmp.lt.u32.totalorder %s2811_s17, %s3553_s1 }
   0xc   :  { %p2817_p2 = pnand %p2815_p1, %p2812_p0 }
   0xe   :  { %2820 = shalt.err (!%p2817_p2)
}
   0xf   :  { %s2821_s22 = scalar_lea.vmem %s46_s30, 640  ;;  %p2826_p4 = scmp.lt.s32.totalorder %s46_s30, %s46_s30 }
  0x10   :  { %p2822_p3 = scmp.ne.s32.totalorder %s46_s30, %s2821_s22  ;;  %p2827_p5 = scmp.lt.s32.totalorder %s2821_s22, %s2821_s22 }
  0x12   :  { %p2828_p6 = por %p2827_p5, %p2826_p4 }
  0x14   :  { %p2829_p7 = pnand %p2828_p6, %p2822_p3 }
  0x16   :  { %2832 = shalt.err (!%p2829_p7)
}
  0x17   :  { %s3160_s23 = smov 320   ;;  %s3161_s24 = smov 20  }
  0x18   :  { %51 = dma.hbm_to_vmem [thread:$0]  %s3553_s1, 640, %s46_s30, [#allocation6], %s3160_s23, %s3160_s23, %s3161_s24  }
  0x19   :  { %s3162_s27 = smov [#allocation8]   ;;  %s3163_s29 = smov [#allocation11]  }
  0x1a   :  { %s70_s28 = sshll.u32 %s3162_s27, 4  ;;  %s92_s15 = sshll.u32 %s3163_s29, 4  ;;  %s71_s28 = int_to_ptr.vmem [resolvable:$true] %s70_s28  ;;  %s93_s15 = int_to_ptr.vmem [resolvable:$true] %s92_s15 }
  0x1b   :  { %s2833_s18 = scalar_lea.hbm %s3555_s3, 32 }
  0x1c   :  { %p2834_p8 = scmp.ne.s32.totalorder %s3555_s3, %s2833_s18  ;;  %p2837_p9 = scmp.lt.u32.totalorder %s2833_s18, %s3555_s3 }
  0x1e   :  { %p2839_p10 = pnand %p2837_p9, %p2834_p8 }
  0x20   :  { %2842 = shalt.err (!%p2839_p10)
}
  0x21   :  { %s2843_s1 = scalar_lea.vmem %s71_s28, 32  ;;  %p2848_p12 = scmp.lt.s32.totalorder %s71_s28, %s71_s28 }
  0x22   :  { %p2844_p11 = scmp.ne.s32.totalorder %s71_s28, %s2843_s1  ;;  %p2849_p13 = scmp.lt.s32.totalorder %s2843_s1, %s2843_s1 }
  0x24   :  { %p2850_p0 = por %p2849_p13, %p2848_p12 }
  0x26   :  { %p2851_p1 = pnand %p2850_p0, %p2844_p11 }
  0x28   :  { %2854 = shalt.err (!%p2851_p1)
}
  0x29   :  { %73 = dma.hbm_to_vmem [thread:$0]  %s3555_s3, 32, %s71_s28, [#allocation9]  }
  0x2a   :  { %s2855_s29 = scalar_lea.hbm %s3557_s5, 80 }
  0x2b   :  { %p2856_p2 = scmp.ne.s32.totalorder %s3557_s5, %s2855_s29  ;;  %p2859_p3 = scmp.lt.u32.totalorder %s2855_s29, %s3557_s5 }
  0x2d   :  { %p2861_p4 = pnand %p2859_p3, %p2856_p2 }
  0x2f   :  { %2864 = shalt.err (!%p2861_p4)
}
  0x30   :  { %s2865_s20 = scalar_lea.vmem %s93_s15, 80  ;;  %s2869_s21 = scalar_lea.vmem %s93_s15, 96 }
  0x31   :  { %p2866_p5 = scmp.ne.s32.totalorder %s93_s15, %s2865_s20  ;;  %p2870_p6 = scmp.lt.s32.totalorder %s93_s15, %s93_s15 }
  0x32   :  { %p2871_p7 = scmp.lt.s32.totalorder %s2869_s21, %s2865_s20 }
  0x34   :  { %p2872_p8 = por %p2871_p7, %p2870_p6 }
  0x36   :  { %p2873_p9 = pnand %p2872_p8, %p2866_p5 }
  0x38   :  { %2876 = shalt.err (!%p2873_p9)
}
  0x39   :  { %95 = dma.hbm_to_vmem [thread:$0]  %s3557_s5, 80, %s93_s15, [#allocation12]  }
  0x3a   :  { %s3164_s22 = smov [#allocation14]   ;;  %s3165_s30 = smov [#allocation17]  }
  0x3b   :  { %s114_s1 = sshll.u32 %s3164_s22, 4  ;;  %s136_s25 = sshll.u32 %s3165_s30, 4  ;;  %s115_s1 = int_to_ptr.vmem [resolvable:$true] %s114_s1  ;;  %s137_s25 = int_to_ptr.vmem [resolvable:$true] %s136_s25 }
  0x3c   :  { %s2877_s29 = scalar_lea.hbm %s3559_s7, 32 }
  0x3d   :  { %p2878_p10 = scmp.ne.s32.totalorder %s3559_s7, %s2877_s29  ;;  %p2881_p11 = scmp.lt.u32.totalorder %s2877_s29, %s3559_s7 }
  0x3f   :  { %p2883_p12 = pnand %p2881_p11, %p2878_p10 }
  0x41   :  { %2886 = shalt.err (!%p2883_p12)
}
  0x42   :  { %s2887_s5 = scalar_lea.vmem %s115_s1, 32  ;;  %p2892_p0 = scmp.lt.s32.totalorder %s115_s1, %s115_s1 }
  0x43   :  { %p2888_p13 = scmp.ne.s32.totalorder %s115_s1, %s2887_s5  ;;  %p2893_p1 = scmp.lt.s32.totalorder %s2887_s5, %s2887_s5 }
  0x45   :  { %p2894_p2 = por %p2893_p1, %p2892_p0 }
  0x47   :  { %p2895_p3 = pnand %p2894_p2, %p2888_p13 }
  0x49   :  { %2898 = shalt.err (!%p2895_p3)
}
  0x4a   :  { %117 = dma.hbm_to_vmem [thread:$0]  %s3559_s7, 32, %s115_s1, [#allocation15]  }
  0x4b   :  { %s2899_s28 = scalar_lea.hbm %s3561_s9, 16 }
  0x4c   :  { %p2900_p4 = scmp.ne.s32.totalorder %s3561_s9, %s2899_s28  ;;  %p2903_p5 = scmp.lt.u32.totalorder %s2899_s28, %s3561_s9 }
  0x4e   :  { %p2905_p6 = pnand %p2903_p5, %p2900_p4 }
  0x50   :  { %2908 = shalt.err (!%p2905_p6)
}
  0x51   :  { %s2909_s29 = scalar_lea.vmem %s137_s25, 16  ;;  %s2913_s16 = scalar_lea.vmem %s137_s25, 32 }
  0x52   :  { %p2910_p7 = scmp.ne.s32.totalorder %s137_s25, %s2909_s29  ;;  %p2914_p8 = scmp.lt.s32.totalorder %s137_s25, %s137_s25 }
  0x53   :  { %p2915_p9 = scmp.lt.s32.totalorder %s2913_s16, %s2909_s29 }
  0x55   :  { %p2916_p10 = por %p2915_p9, %p2914_p8 }
  0x57   :  { %p2917_p11 = pnand %p2916_p10, %p2910_p7 }
  0x59   :  { %2920 = shalt.err (!%p2917_p11)
}
  0x5a   :  { %139 = dma.hbm_to_vmem [thread:$0]  %s3561_s9, 16, %s137_s25, [#allocation18]  }
  0x5b   :  { %s3166_s17 = smov [#allocation20]   ;;  %s3167_s19 = smov [#allocation2]  }
  0x5c   :  { %s158_s18 = sshll.u32 %s3166_s17, 4  ;;  %s33_s5 = sshll.u32 %s3167_s19, 4  ;;  %s159_s18 = int_to_ptr.vmem [resolvable:$true] %s158_s18  ;;  %s34_s5 = int_to_ptr.vmem [resolvable:$true] %s33_s5 }
  0x5d   :  { %s2921_s21 = scalar_lea.hbm %s3563_s11, 16 }
  0x5e   :  { %p2922_p12 = scmp.ne.s32.totalorder %s3563_s11, %s2921_s21  ;;  %p2925_p13 = scmp.lt.u32.totalorder %s2921_s21, %s3563_s11 }
  0x60   :  { %p2927_p0 = pnand %p2925_p13, %p2922_p12 }
  0x62   :  { %2930 = shalt.err (!%p2927_p0)
}
  0x63   :  { %s2931_s9 = scalar_lea.vmem %s159_s18, 16  ;;  %s2935_s25 = scalar_lea.vmem %s159_s18, 32 }
  0x64   :  { %p2932_p1 = scmp.ne.s32.totalorder %s159_s18, %s2931_s9  ;;  %p2936_p2 = scmp.lt.s32.totalorder %s159_s18, %s159_s18 }
  0x65   :  { %p2937_p3 = scmp.lt.s32.totalorder %s2935_s25, %s2931_s9 }
  0x67   :  { %p2938_p4 = por %p2937_p3, %p2936_p2 }
  0x69   :  { %p2939_p5 = pnand %p2938_p4, %p2932_p1 }
  0x6b   :  { %2942 = shalt.err (!%p2939_p5)
}
  0x6c   :  { %161 = dma.hbm_to_vmem [thread:$0]  %s3563_s11, 16, %s159_s18, [#allocation21]  }
  0x6d   :  { %s2943_s7 = scalar_lea.hbm %s3552_s0, 128 }
  0x6e   :  { %p2944_p6 = scmp.ne.s32.totalorder %s3552_s0, %s2943_s7  ;;  %p2947_p7 = scmp.lt.u32.totalorder %s2943_s7, %s3552_s0 }
  0x70   :  { %p2949_p8 = pnand %p2947_p7, %p2944_p6 }
  0x72   :  { %2952 = shalt.err (!%p2949_p8)
}
  0x73   :  { %s2953_s20 = scalar_lea.vmem %s34_s5, 128  ;;  %p2958_p10 = scmp.lt.s32.totalorder %s34_s5, %s34_s5 }
  0x74   :  { %p2954_p9 = scmp.ne.s32.totalorder %s34_s5, %s2953_s20  ;;  %p2959_p11 = scmp.lt.s32.totalorder %s2953_s20, %s2953_s20 }
  0x76   :  { %p2960_p12 = por %p2959_p11, %p2958_p10 }
  0x78   :  { %p2961_p13 = pnand %p2960_p12, %p2954_p9 }
  0x7a   :  { %2964 = shalt.err (!%p2961_p13)
}
  0x7b   :  { %s3168_s11 = smov 64   ;;  %s3169_s18 = smov 4  }
  0x7c   :  { %39 = dma.hbm_to_vmem [thread:$0]  %s3552_s0, 128, %s34_s5, [#allocation3], %s3168_s11, %s3168_s11, %s3169_s18  }
  0x7d   :  { %s3170_s28 = smov [#allocation7]   ;;  %s2965_s25 = scalar_lea.hbm %s3554_s2, 2048 }
  0x7e   :  { %s57_s22 = sshll.u32 %s3170_s28, 4  ;;  %p2966_p0 = scmp.ne.s32.totalorder %s3554_s2, %s2965_s25  ;;  %s58_s22 = int_to_ptr.vmem [resolvable:$true] %s57_s22 }
  0x7f   :  { %p2969_p1 = scmp.lt.u32.totalorder %s2965_s25, %s3554_s2 }
  0x81   :  { %p2971_p2 = pnand %p2969_p1, %p2966_p0 }
  0x83   :  { %2974 = shalt.err (!%p2971_p2)
}
  0x84   :  { %s2975_s7 = scalar_lea.vmem %s58_s22, 2048  ;;  %p2980_p4 = scmp.lt.s32.totalorder %s58_s22, %s58_s22 }
  0x85   :  { %p2976_p3 = scmp.ne.s32.totalorder %s58_s22, %s2975_s7  ;;  %p2981_p5 = scmp.lt.s32.totalorder %s2975_s7, %s2975_s7 }
  0x87   :  { %p2982_p6 = por %p2981_p5, %p2980_p4 }
  0x89   :  { %p2983_p7 = pnand %p2982_p6, %p2976_p3 }
  0x8b   :  { %2986 = shalt.err (!%p2983_p7)
}
  0x8c   :  { %s3171_s0 = smov 128   ;;  %s3172_s5 = smov 8  }
  0x8d   :  { %63 = dma.hbm_to_vmem [thread:$0]  %s3554_s2, 2048, %s58_s22, [#allocation6], %s3171_s0, %s3171_s0, %s3172_s5  }
  0x8e   :  { %s3173_s19 = smov [#allocation10]   ;;  %s3174_s20 = smov [#allocation13]  }
  0x8f   :  { %s79_s15 = sshll.u32 %s3173_s19, 4  ;;  %s101_s21 = sshll.u32 %s3174_s20, 4  ;;  %s80_s15 = int_to_ptr.vmem [resolvable:$true] %s79_s15  ;;  %s3363_s21 = int_to_ptr.vmem [resolvable:$true] %s101_s21 }
  0x90   :  { %s2987_s30 = scalar_lea.hbm %s3556_s4, 10240 }
  0x91   :  { %p2988_p8 = scmp.ne.s32.totalorder %s3556_s4, %s2987_s30  ;;  %p2991_p9 = scmp.lt.u32.totalorder %s2987_s30, %s3556_s4 }
  0x93   :  { %p2993_p10 = pnand %p2991_p9, %p2988_p8 }
  0x95   :  { %2996 = shalt.err (!%p2993_p10)
}
  0x96   :  { %s2997_s2 = scalar_lea.vmem %s80_s15, 10240  ;;  %p3002_p12 = scmp.lt.s32.totalorder %s80_s15, %s80_s15 }
  0x97   :  { %p2998_p11 = scmp.ne.s32.totalorder %s80_s15, %s2997_s2  ;;  %p3003_p13 = scmp.lt.s32.totalorder %s2997_s2, %s2997_s2 }
  0x99   :  { %p3004_p0 = por %p3003_p13, %p3002_p12 }
  0x9b   :  { %p3005_p1 = pnand %p3004_p0, %p2998_p11 }
  0x9d   :  { %3008 = shalt.err (!%p3005_p1)
}
  0x9e   :  { %85 = dma.hbm_to_vmem [thread:$0]  %s3556_s4, 10240, %s80_s15, [#allocation9], %s3160_s23, %s3160_s23, %s3161_s24  }
  0x9f   :  { %s3009_s1 = scalar_lea.hbm %s3558_s6, 10240 }
  0xa0   :  { %p3010_p2 = scmp.ne.s32.totalorder %s3558_s6, %s3009_s1  ;;  %p3013_p3 = scmp.lt.u32.totalorder %s3009_s1, %s3558_s6 }
  0xa2   :  { %p3015_p4 = pnand %p3013_p3, %p3010_p2 }
  0xa4   :  { %3018 = shalt.err (!%p3015_p4)
}
  0xa5   :  { %s3019_s28 = scalar_lea.vmem %s3363_s21, 10240  ;;  %p3024_p6 = scmp.lt.s32.totalorder %s3363_s21, %s3363_s21 }
  0xa6   :  { %p3020_p5 = scmp.ne.s32.totalorder %s3363_s21, %s3019_s28  ;;  %p3025_p7 = scmp.lt.s32.totalorder %s3019_s28, %s3019_s28 }
  0xa8   :  { %p3026_p8 = por %p3025_p7, %p3024_p6 }
  0xaa   :  { %p3027_p9 = pnand %p3026_p8, %p3020_p5 }
  0xac   :  { %3030 = shalt.err (!%p3027_p9)
}
  0xad   :  { %107 = dma.hbm_to_vmem [thread:$0]  %s3558_s6, 10240, %s3363_s21, [#allocation12], %s3171_s0, %s3171_s0, %s3172_s5  }
  0xae   :  { %s3175_s24 = smov [#allocation16]   ;;  %s3176_s30 = smov [#allocation19]  }
  0xaf   :  { %s123_s15 = sshll.u32 %s3175_s24, 4  ;;  %s145_s9 = sshll.u32 %s3176_s30, 4  ;;  %s124_s15 = int_to_ptr.vmem [resolvable:$true] %s123_s15  ;;  %s3400_s9 = int_to_ptr.vmem [resolvable:$true] %s145_s9 }
  0xb0   :  { %s3031_s27 = scalar_lea.hbm %s3560_s8, 2048 }
  0xb1   :  { %p3032_p10 = scmp.ne.s32.totalorder %s3560_s8, %s3031_s27  ;;  %p3035_p11 = scmp.lt.u32.totalorder %s3031_s27, %s3560_s8 }
  0xb3   :  { %p3037_p12 = pnand %p3035_p11, %p3032_p10 }
  0xb5   :  { %3040 = shalt.err (!%p3037_p12)
}
  0xb6   :  { %s3041_s6 = scalar_lea.vmem %s124_s15, 2048  ;;  %p3046_p0 = scmp.lt.s32.totalorder %s124_s15, %s124_s15 }
  0xb7   :  { %p3042_p13 = scmp.ne.s32.totalorder %s124_s15, %s3041_s6  ;;  %p3047_p1 = scmp.lt.s32.totalorder %s3041_s6, %s3041_s6 }
  0xb9   :  { %p3048_p2 = por %p3047_p1, %p3046_p0 }
  0xbb   :  { %p3049_p3 = pnand %p3048_p2, %p3042_p13 }
  0xbd   :  { %3052 = shalt.err (!%p3049_p3)
}
  0xbe   :  { %129 = dma.hbm_to_vmem [thread:$0]  %s3560_s8, 2048, %s124_s15, [#allocation15], %s3168_s11, %s3168_s11, %s3169_s18  }
  0xbf   :  { %s3053_s1 = scalar_lea.hbm %s3562_s10, 1024 }
  0xc0   :  { %p3054_p4 = scmp.ne.s32.totalorder %s3562_s10, %s3053_s1  ;;  %p3057_p5 = scmp.lt.u32.totalorder %s3053_s1, %s3562_s10 }
  0xc2   :  { %p3059_p6 = pnand %p3057_p5, %p3054_p4 }
  0xc4   :  { %3062 = shalt.err (!%p3059_p6)
}
  0xc5   :  { %s3063_s28 = scalar_lea.vmem %s3400_s9, 1024  ;;  %p3068_p8 = scmp.lt.s32.totalorder %s3400_s9, %s3400_s9 }
  0xc6   :  { %p3064_p7 = scmp.ne.s32.totalorder %s3400_s9, %s3063_s28  ;;  %p3069_p9 = scmp.lt.s32.totalorder %s3063_s28, %s3063_s28 }
  0xc8   :  { %p3070_p10 = por %p3069_p9, %p3068_p8 }
  0xca   :  { %p3071_p11 = pnand %p3070_p10, %p3064_p7 }
  0xcc   :  { %3074 = shalt.err (!%p3071_p11)
}
  0xcd   :  { %151 = dma.hbm_to_vmem [thread:$0]  %s3562_s10, 1024, %s3400_s9, [#allocation18], %s3168_s11, %s3168_s11, %s3169_s18  }
  0xce   :  { %s3177_s23 = smov [#allocation22]   ;;  %s3178_s15 = smov [#allocation23]  }
  0xcf   :  { %s167_s24 = sshll.u32 %s3177_s23, 4  ;;  %s180_s30 = sshll.u32 %s3178_s15, 4  ;;  %s168_s24 = int_to_ptr.vmem [resolvable:$true] %s167_s24  ;;  %s181_s30 = int_to_ptr.vmem [resolvable:$true] %s180_s30 }
  0xd0   :  { %s3075_s27 = scalar_lea.hbm %s3564_s12, 512 }
  0xd1   :  { %p3076_p12 = scmp.ne.s32.totalorder %s3564_s12, %s3075_s27  ;;  %p3079_p13 = scmp.lt.u32.totalorder %s3075_s27, %s3564_s12 }
  0xd3   :  { %p3081_p0 = pnand %p3079_p13, %p3076_p12 }
  0xd5   :  { %3084 = shalt.err (!%p3081_p0)
}
  0xd6   :  { %s3085_s10 = scalar_lea.vmem %s168_s24, 512  ;;  %p3090_p2 = scmp.lt.s32.totalorder %s168_s24, %s168_s24 }
  0xd7   :  { %p3086_p1 = scmp.ne.s32.totalorder %s168_s24, %s3085_s10  ;;  %p3091_p3 = scmp.lt.s32.totalorder %s3085_s10, %s3085_s10 }
  0xd9   :  { %p3092_p4 = por %p3091_p3, %p3090_p2 }
  0xdb   :  { %p3093_p5 = pnand %p3092_p4, %p3086_p1 }
  0xdd   :  { %3096 = shalt.err (!%p3093_p5)
}
  0xde   :  { %173 = dma.hbm_to_vmem [thread:$0]  %s3564_s12, 512, %s168_s24, [#allocation21], %s3168_s11, %s3168_s11, %s3169_s18  }
  0xdf   :  { %s3097_s21 = scalar_lea.hbm %s3565_s13, 16 }
  0xe0   :  { %p3098_p6 = scmp.ne.s32.totalorder %s3565_s13, %s3097_s21  ;;  %p3101_p7 = scmp.lt.u32.totalorder %s3097_s21, %s3565_s13 }
  0xe2   :  { %p3103_p8 = pnand %p3101_p7, %p3098_p6 }
  0xe4   :  { %3106 = shalt.err (!%p3103_p8)
}
  0xe5   :  { %s3107_s20 = scalar_lea.vmem %s181_s30, 16  ;;  %s3111_s3 = scalar_lea.vmem %s181_s30, 32 }
  0xe6   :  { %p3108_p9 = scmp.ne.s32.totalorder %s181_s30, %s3107_s20  ;;  %p3112_p10 = scmp.lt.s32.totalorder %s181_s30, %s181_s30 }
  0xe7   :  { %p3113_p11 = scmp.lt.s32.totalorder %s3111_s3, %s3107_s20 }
  0xe9   :  { %p3114_p12 = por %p3113_p11, %p3112_p10 }
  0xeb   :  { %p3115_p13 = pnand %p3114_p12, %p3108_p9 }
  0xed   :  { %3118 = shalt.err (!%p3115_p13)
}
  0xee   :  { %183 = dma.hbm_to_vmem [thread:$0]  %s3565_s13, 16, %s181_s30, [#allocation24]  }
  0xef   :  { %3141 = dma.done.wait [#allocation3], 128  }
  0xf0   :  { %3142 = vsyncadd [#allocation3], 4294967168 }
  0xf1   :  { %3143 = dma.done.wait [#allocation6], 2688  }
  0xf2   :  { %3144 = vsyncadd [#allocation6], 4294964608 }
  0xf3   :  { %3145 = dma.done.wait [#allocation9], 10272  }
  0xf4   :  { %3146 = vsyncadd [#allocation9], 4294957024 }
  0xf5   :  { %3147 = dma.done.wait [#allocation12], 10320  }
  0xf6   :  { %3148 = vsyncadd [#allocation12], 4294956976 }
  0xf7   :  { %3149 = dma.done.wait [#allocation15], 2080  }
  0xf8   :  { %3150 = vsyncadd [#allocation15], 4294965216 }
  0xf9   :  { %3151 = dma.done.wait [#allocation18], 1040  }
  0xfa   :  { %3152 = vsyncadd [#allocation18], 4294966256 }
  0xfb   :  { %3153 = dma.done.wait [#allocation21], 528  }
  0xfc   :  { %3154 = vsyncadd [#allocation21], 4294966768 }
  0xfd   :  { %3155 = dma.done.wait [#allocation24], 16  }
  0xfe   :  { %3156 = vsyncadd [#allocation24], 4294967280  ;;  %v3179_v0 = vmov 0   ;;  %v2526_v1 = vld [vmem:[#allocation7 + $0x4] ss:$8 sps:$4 sm:$0xff]   ;;  %v2550_v29 = vld [vmem:[#allocation2] sm:$0xff]  }
  0xff   :  { %375 = vmatprep.mubr.bf16.mxu1 %v3179_v0  ;;  %v2528_v2 = vld [vmem:[#allocation7] ss:$8 sps:$4 sm:$0xff]   ;;  %343 = vmatprep.subr.bf16.mxu1 %v2526_v1  ;;  %v2529_v3 = vld [vmem:[#allocation7 + $0x14] ss:$8 sps:$4 sm:$0xff]   ;;  %v2531_v4 = vld [vmem:[#allocation7 + $0x10] ss:$8 sps:$4 sm:$0xff]  }
 0x100   :  { %344 = vmatpush1.bf16.msra.mxu1 %v2528_v2  ;;  %v2532_v5 = vld [vmem:[#allocation7 + $0x24] ss:$8 sps:$4 sm:$0xff]   ;;  %v2534_v6 = vld [vmem:[#allocation7 + $0x20] ss:$8 sps:$4 sm:$0xff]   ;;  %v2535_v7 = vld [vmem:[#allocation7 + $0x34] ss:$8 sps:$4 sm:$0xff]  }
 0x101   :  { %345 = vmatprep.subr.bf16.mxu1 %v2529_v3  ;;  %v2537_v8 = vld [vmem:[#allocation7 + $0x30] ss:$8 sps:$4 sm:$0xff]   ;;  %v2538_v9 = vld [vmem:[#allocation7 + $0x44] ss:$8 sps:$4 sm:$0xff]   ;;  %v2540_v12 = vld [vmem:[#allocation7 + $0x40] ss:$8 sps:$4 sm:$0xff]  }
 0x102   :  { %v2554_v10 = vld [vmem:[#allocation10 + $0xc] ss:$20 sps:$4 sm:$0xff]   ;;  %v2556_v11 = vld [vmem:[#allocation10 + $0x8] ss:$20 sps:$4 sm:$0xff]   ;;  %v2562_v15 = vld [vmem:[#allocation10 + $0x30] ss:$20 sps:$4 sm:$0xff]  }
 0x103   :  { %v2541_v13 = vld [vmem:[#allocation7 + $0x54] ss:$8 sps:$4 sm:$0xff]   ;;  %982 = vmatprep.subr.bf16.mxu0 %v2554_v10  ;;  %v2543_v16 = vld [vmem:[#allocation7 + $0x50] ss:$8 sps:$4 sm:$0xff]   ;;  %v2544_v18 = vld [vmem:[#allocation7 + $0x64] ss:$8 sps:$4 sm:$0xff]  }
 0x104   :  { %346 = vmatpush1.bf16.msra.mxu1 %v2531_v4  ;;  %983 = vmatpush1.bf16.msra.mxu0 %v2556_v11  ;;  %v2560_v14 = vld [vmem:[#allocation10 + $0x34] ss:$20 sps:$4 sm:$0xff]   ;;  %v2566_v17 = vld [vmem:[#allocation10 + $0x5c] ss:$20 sps:$4 sm:$0xff]   ;;  %v2568_v19 = vld [vmem:[#allocation10 + $0x58] ss:$20 sps:$4 sm:$0xff]  }
 0x105   :  { %347 = vmatprep.subr.bf16.mxu1 %v2532_v5  ;;  %984 = vmatprep.subr.bf16.mxu0 %v2560_v14  ;;  %v2572_v20 = vld [vmem:[#allocation10 + $0x84] ss:$20 sps:$4 sm:$0xff]   ;;  %v2574_v23 = vld [vmem:[#allocation10 + $0x80] ss:$20 sps:$4 sm:$0xff]   ;;  %v2580_v27 = vld [vmem:[#allocation10 + $0xa8] ss:$20 sps:$4 sm:$0xff]  }
 0x106   :  { %v2546_v21 = vld [vmem:[#allocation7 + $0x60] ss:$8 sps:$4 sm:$0xff]   ;;  %v2547_v22 = vld [vmem:[#allocation7 + $0x74] ss:$8 sps:$4 sm:$0xff]   ;;  %v2549_v25 = vld [vmem:[#allocation7 + $0x70] ss:$8 sps:$4 sm:$0xff]  }
 0x107   :  { %v2578_v24 = vld [vmem:[#allocation10 + $0xac] ss:$20 sps:$4 sm:$0xff]   ;;  %v2553_v26 = vld [vmem:[#allocation10 + $0x4] ss:$20 sps:$4 sm:$0xff]   ;;  %v2584_v28 = vld [vmem:[#allocation10 + $0xd4] ss:$20 sps:$4 sm:$0xff]  }
 0x108   :  { %348 = vmatpush1.bf16.msra.mxu1 %v2534_v6  ;;  %985 = vmatpush1.bf16.msra.mxu0 %v2562_v15  ;;  %v2551_v30 = vld [vmem:[#allocation10] ss:$20 sps:$4 sm:$0xff]   ;;  %v2586_v32 = vld [vmem:[#allocation10 + $0xd0] ss:$20 sps:$4 sm:$0xff]   ;;  %v2557_v34 = vld [vmem:[#allocation10 + $0x28] ss:$20 sps:$4 sm:$0xff]  }
 0x109   :  { %349 = vmatprep.subr.bf16.mxu1 %v2535_v7  ;;  %986 = vmatprep.subr.bf16.mxu0 %v2566_v17  ;;  %v2559_v31 = vld [vmem:[#allocation10 + $0x2c] ss:$20 sps:$4 sm:$0xff]   ;;  %v2590_v33 = vld [vmem:[#allocation10 + $0xfc] ss:$20 sps:$4 sm:$0xff]   ;;  %v2565_v35 = vld [vmem:[#allocation10 + $0x54] ss:$20 sps:$4 sm:$0xff]  }
 0x10a   :  { %v2592_v36 = vld [vmem:[#allocation10 + $0xf8] ss:$20 sps:$4 sm:$0xff]   ;;  %v2563_v38 = vld [vmem:[#allocation10 + $0x50] ss:$20 sps:$4 sm:$0xff]   ;;  %v2598_v40 = vld [vmem:[#allocation10 + $0x120] ss:$20 sps:$4 sm:$0xff]  }
 0x10b   :  { %v2596_v37 = vld [vmem:[#allocation10 + $0x124] ss:$20 sps:$4 sm:$0xff]   ;;  %v2571_v39 = vld [vmem:[#allocation10 + $0x7c] ss:$20 sps:$4 sm:$0xff]   ;;  %v2602_v41 = vld [vmem:[#allocation10 + $0x14c] ss:$20 sps:$4 sm:$0xff]  }
 0x10c   :  { %350 = vmatpush1.bf16.msra.mxu1 %v2537_v8  ;;  %987 = vmatpush1.bf16.msra.mxu0 %v2568_v19  ;;  %v2569_v42 = vld [vmem:[#allocation10 + $0x78] ss:$20 sps:$4 sm:$0xff]   ;;  %v2604_v44 = vld [vmem:[#allocation10 + $0x148] ss:$20 sps:$4 sm:$0xff]   ;;  %v2575_v46 = vld [vmem:[#allocation10 + $0xa0] ss:$20 sps:$4 sm:$0xff]  }
 0x10d   :  { %351 = vmatprep.subr.bf16.mxu1 %v2538_v9  ;;  %988 = vmatprep.subr.bf16.mxu0 %v2572_v20  ;;  %v2577_v43 = vld [vmem:[#allocation10 + $0xa4] ss:$20 sps:$4 sm:$0xff]   ;;  %v2608_v45 = vld [vmem:[#allocation10 + $0x174] ss:$20 sps:$4 sm:$0xff]   ;;  %v2583_v47 = vld [vmem:[#allocation10 + $0xcc] ss:$20 sps:$4 sm:$0xff]  }
 0x10e   :  { %v2610_v48 = vld [vmem:[#allocation10 + $0x170] ss:$20 sps:$4 sm:$0xff]   ;;  %v2581_v50 = vld [vmem:[#allocation10 + $0xc8] ss:$20 sps:$4 sm:$0xff]   ;;  %v2616_v52 = vld [vmem:[#allocation10 + $0x198] ss:$20 sps:$4 sm:$0xff]  }
 0x10f   :  { %v2614_v49 = vld [vmem:[#allocation10 + $0x19c] ss:$20 sps:$4 sm:$0xff]   ;;  %v2589_v51 = vld [vmem:[#allocation10 + $0xf4] ss:$20 sps:$4 sm:$0xff]   ;;  %v2620_v53 = vld [vmem:[#allocation10 + $0x1c4] ss:$20 sps:$4 sm:$0xff]  }
 0x110   :  { %352 = vmatpush1.bf16.msra.mxu1 %v2540_v12  ;;  %989 = vmatpush1.bf16.msra.mxu0 %v2574_v23  ;;  %v2587_v54 = vld [vmem:[#allocation10 + $0xf0] ss:$20 sps:$4 sm:$0xff]   ;;  %v2622_v56 = vld [vmem:[#allocation10 + $0x1c0] ss:$20 sps:$4 sm:$0xff]   ;;  %v2593_v58 = vld [vmem:[#allocation10 + $0x118] ss:$20 sps:$4 sm:$0xff]  }
 0x111   :  { %353 = vmatprep.subr.bf16.mxu1 %v2541_v13  ;;  %990 = vmatprep.subr.bf16.mxu0 %v2578_v24  ;;  %v2595_v55 = vld [vmem:[#allocation10 + $0x11c] ss:$20 sps:$4 sm:$0xff]   ;;  %v2626_v57 = vld [vmem:[#allocation10 + $0x1ec] ss:$20 sps:$4 sm:$0xff]   ;;  %v2601_v59 = vld [vmem:[#allocation10 + $0x144] ss:$20 sps:$4 sm:$0xff]  }
 0x112   :  { %v2628_v60 = vld [vmem:[#allocation10 + $0x1e8] ss:$20 sps:$4 sm:$0xff]   ;;  %v2599_v61 = vld [vmem:[#allocation10 + $0x140] ss:$20 sps:$4 sm:$0xff]   ;;  %v2611_v2 = vld [vmem:[#allocation10 + $0x190] ss:$20 sps:$4 sm:$0xff]  }
 0x113   :  { %v2607_v62 = vld [vmem:[#allocation10 + $0x16c] ss:$20 sps:$4 sm:$0xff]   ;;  %v2605_v63 = vld [vmem:[#allocation10 + $0x168] ss:$20 sps:$4 sm:$0xff]   ;;  %v2625_v5 = vld [vmem:[#allocation10 + $0x1e4] ss:$20 sps:$4 sm:$0xff]  }
 0x114   :  { %354 = vmatpush1.bf16.msra.mxu1 %v2543_v16  ;;  %991 = vmatpush1.bf16.msra.mxu0 %v2580_v27  ;;  %v2613_v1 = vld [vmem:[#allocation10 + $0x194] ss:$20 sps:$4 sm:$0xff]   ;;  %v2619_v3 = vld [vmem:[#allocation10 + $0x1bc] ss:$20 sps:$4 sm:$0xff]   ;;  %v2617_v4 = vld [vmem:[#allocation10 + $0x1b8] ss:$20 sps:$4 sm:$0xff]  }
 0x115   :  { %355 = vmatprep.subr.bf16.mxu1 %v2544_v18  ;;  %992 = vmatprep.subr.bf16.mxu0 %v2584_v28  ;;  %v2623_v6 = vld [vmem:[#allocation10 + $0x1e0] ss:$20 sps:$4 sm:$0xff]   ;;  %v2629_v8 = vld [vmem:[#allocation10 + $0x208] ss:$20 sps:$4 sm:$0xff]   ;;  %v2634_v10 = vld [vmem:[#allocation10 + $0x210] ss:$20 sps:$4 sm:$0xff]  }
 0x116   :  { %v2631_v7 = vld [vmem:[#allocation10 + $0x20c] ss:$20 sps:$4 sm:$0xff]   ;;  %v2632_v9 = vld [vmem:[#allocation10 + $0x214] ss:$20 sps:$4 sm:$0xff]   ;;  %v2635_v12 = vld [vmem:[#allocation10 + $0x230] ss:$20 sps:$4 sm:$0xff]  }
 0x117   :  { %v2637_v11 = vld [vmem:[#allocation10 + $0x234] ss:$20 sps:$4 sm:$0xff]   ;;  %v2638_v13 = vld [vmem:[#allocation10 + $0x23c] ss:$20 sps:$4 sm:$0xff]   ;;  %v2640_v14 = vld [vmem:[#allocation10 + $0x238] ss:$20 sps:$4 sm:$0xff]  }
 0x118   :  { %356 = vmatpush1.bf16.msra.mxu1 %v2546_v21  ;;  %993 = vmatpush1.bf16.msra.mxu0 %v2586_v32  ;;  %v2643_v15 = vld [vmem:[#allocation10 + $0x25c] ss:$20 sps:$4 sm:$0xff]   ;;  %v2641_v16 = vld [vmem:[#allocation10 + $0x258] ss:$20 sps:$4 sm:$0xff]   ;;  %v2646_v18 = vld [vmem:[#allocation10 + $0x260] ss:$20 sps:$4 sm:$0xff]   ;;  %v247_v21 = vlaneseq }
 0x119   :  { %357 = vmatprep.subr.bf16.mxu1 %v2547_v22  ;;  %994 = vmatprep.subr.bf16.mxu0 %v2590_v33  ;;  %v2644_v17 = vld [vmem:[#allocation10 + $0x264] ss:$20 sps:$4 sm:$0xff]   ;;  %v2665_v20 = vld [vmem:[#allocation13 + $0x4] ss:$8 sps:$4 sm:$0xff]   ;;  %v245_v24 = vld [vmem:[#allocation8] sm:$0x3] }
 0x11a   :  { %v2647_v19 = vld [vmem:[#allocation10 + $0x150] ss:$20 sps:$4 sm:$0xff]   ;;  %v3465_v22 = vshrl.u32 %v247_v21, 7  ;;  %s3182_s13 = smov [#allocation25]  }
 0x11b   :  { %v2701_v21 = vld [vmem:[#allocation13 + $0xc4] ss:$8 sps:$4 sm:$0xff]   ;;  %s2163_s8 = sshll.u32 %s3182_s13, 4  ;;  %s2164_s8 = int_to_ptr.vmem [resolvable:$true] %s2163_s8 }
 0x11c   :  { %358 = vmatpush1.bf16.msra.mxu1 %v2549_v25  ;;  %995 = vmatpush1.bf16.msra.mxu0 %v2592_v36  ;;  %v3468_v23 = vsub.s32 0, %v3465_v22  ;;  %v3471_v25 = vsub.s32 1, %v3465_v22  ;;  %s3119_s4 = scalar_lea.vmem %s2164_s8, 128  ;;  %p3124_p1 = scmp.lt.s32.totalorder %s2164_s8, %s2164_s8 }
 0x11d   :  { %939 = vmatprep.subr.bf16.mxu1 %v2553_v26  ;;  %996 = vmatprep.subr.bf16.mxu0 %v2596_v37  ;;  %p3120_p0 = scmp.ne.s32.totalorder %s2164_s8, %s3119_s4  ;;  %p3125_p2 = scmp.lt.s32.totalorder %s3119_s4, %s3119_s4 }
 0x11e   :  { %v250_v26 = vrot.slane %v245_v24, %v3468_v23  ;;  %v254_v27 = vrot.slane %v245_v24, %v3471_v25  ;;  %v2699_v24 = vld [vmem:[#allocation13 + $0xc0] ss:$8 sps:$4 sm:$0xff]  }
 0x11f   :  { %376 = vmatmul.mubr.bf16.vlgmr.msra.gmra.mrb[0].mxu1 %v2550_v29  ;;  %p3126_p3 = por %p3125_p2, %p3124_p1 }
 0x120   :  { %940 = vmatpush1.bf16.msra.mxu1 %v2551_v30  ;;  %997 = vmatpush1.bf16.msra.mxu0 %v2598_v40 }
 0x121   :  { %941 = vmatprep.subr.bf16.mxu1 %v2559_v31  ;;  %998 = vmatprep.subr.bf16.mxu0 %v2602_v41  ;;  %p3127_p4 = pnand %p3126_p3, %p3120_p0 }
 0x124   :  { %942 = vmatpush1.bf16.msra.mxu1 %v2557_v34  ;;  %999 = vmatpush1.bf16.msra.mxu0 %v2604_v44 }
 0x125   :  { %943 = vmatprep.subr.bf16.mxu1 %v2565_v35  ;;  %1000 = vmatprep.subr.bf16.mxu0 %v2608_v45 }
 0x128   :  { %944 = vmatpush1.bf16.msra.mxu1 %v2563_v38  ;;  %1001 = vmatpush1.bf16.msra.mxu0 %v2610_v48  ;;  %v2663_v48 = vld [vmem:[#allocation13] ss:$8 sps:$4 sm:$0xff]  }
 0x129   :  { %945 = vmatprep.subr.bf16.mxu1 %v2571_v39  ;;  %1002 = vmatprep.subr.bf16.mxu0 %v2614_v49  ;;  %v2668_v49 = vld [vmem:[#allocation13 + $0x14] ss:$8 sps:$4 sm:$0xff]  }
 0x12c   :  { %946 = vmatpush1.bf16.msra.mxu1 %v2569_v42  ;;  %1003 = vmatpush1.bf16.msra.mxu0 %v2616_v52  ;;  %v2666_v52 = vld [vmem:[#allocation13 + $0x10] ss:$8 sps:$4 sm:$0xff]  }
 0x12d   :  { %947 = vmatprep.subr.bf16.mxu1 %v2577_v43  ;;  %1004 = vmatprep.subr.bf16.mxu0 %v2620_v53  ;;  %v2671_v53 = vld [vmem:[#allocation13 + $0x24] ss:$8 sps:$4 sm:$0xff]  }
 0x130   :  { %948 = vmatpush1.bf16.msra.mxu1 %v2575_v46  ;;  %1005 = vmatpush1.bf16.msra.mxu0 %v2622_v56  ;;  %v2648_v46 = vld [vmem:[#allocation10 + $0x10] ss:$20 sps:$4 sm:$0xff]  }
 0x131   :  { %949 = vmatprep.subr.bf16.mxu1 %v2583_v47  ;;  %1006 = vmatprep.subr.bf16.mxu0 %v2626_v57  ;;  %v2649_v47 = vld [vmem:[#allocation10 + $0x178] ss:$20 sps:$4 sm:$0xff]  }
 0x132   :  { %v2669_v56 = vld [vmem:[#allocation13 + $0x20] ss:$8 sps:$4 sm:$0xff]   ;;  %v2674_v57 = vld [vmem:[#allocation13 + $0x34] ss:$8 sps:$4 sm:$0xff]  }
 0x134   :  { %950 = vmatpush1.bf16.msra.mxu1 %v2581_v50  ;;  %1007 = vmatpush1.bf16.msra.mxu0 %v2628_v60  ;;  %v2650_v50 = vld [vmem:[#allocation10 + $0x38] ss:$20 sps:$4 sm:$0xff]  }
 0x135   :  { %951 = vmatprep.subr.bf16.mxu1 %v2589_v51  ;;  %1008 = vmatprep.subr.bf16.mxu0 %v2632_v9  ;;  %v2651_v51 = vld [vmem:[#allocation10 + $0x1a0] ss:$20 sps:$4 sm:$0xff]   ;;  %v2681_v9 = vld [vmem:[#allocation13 + $0x60] ss:$8 sps:$4 sm:$0xff]  }
 0x136   :  { %v2672_v60 = vld [vmem:[#allocation13 + $0x30] ss:$8 sps:$4 sm:$0xff]  }
 0x138   :  { %952 = vmatpush1.bf16.msra.mxu1 %v2587_v54  ;;  %1009 = vmatpush1.bf16.msra.mxu0 %v2634_v10  ;;  %v2652_v54 = vld [vmem:[#allocation10 + $0x60] ss:$20 sps:$4 sm:$0xff]  }
 0x139   :  { %953 = vmatprep.subr.bf16.mxu1 %v2595_v55  ;;  %1010 = vmatprep.subr.bf16.mxu0 %v2638_v13  ;;  %v2653_v55 = vld [vmem:[#allocation10 + $0x1c8] ss:$20 sps:$4 sm:$0xff]  }
 0x13a   :  { %v2686_v10 = vld [vmem:[#allocation13 + $0x74] ss:$8 sps:$4 sm:$0xff]   ;;  %v2689_v13 = vld [vmem:[#allocation13 + $0x84] ss:$8 sps:$4 sm:$0xff]  }
 0x13c   :  { %954 = vmatpush1.bf16.msra.mxu1 %v2593_v58  ;;  %1011 = vmatpush1.bf16.msra.mxu0 %v2640_v14  ;;  %v2654_v58 = vld [vmem:[#allocation10 + $0x88] ss:$20 sps:$4 sm:$0xff]  }
 0x13d   :  { %955 = vmatprep.subr.bf16.mxu1 %v2601_v59  ;;  %1012 = vmatprep.subr.bf16.mxu0 %v2644_v17  ;;  %v2655_v59 = vld [vmem:[#allocation10 + $0x1f0] ss:$20 sps:$4 sm:$0xff]  }
 0x13e   :  { %v2687_v14 = vld [vmem:[#allocation13 + $0x80] ss:$8 sps:$4 sm:$0xff]   ;;  %v2695_v17 = vld [vmem:[#allocation13 + $0xa4] ss:$8 sps:$4 sm:$0xff]  }
 0x140   :  { %956 = vmatpush1.bf16.msra.mxu1 %v2599_v61  ;;  %1013 = vmatpush1.bf16.msra.mxu0 %v2646_v18  ;;  %v2677_v61 = vld [vmem:[#allocation13 + $0x44] ss:$8 sps:$4 sm:$0xff]   ;;  %v2693_v18 = vld [vmem:[#allocation13 + $0xa0] ss:$8 sps:$4 sm:$0xff]  }
 0x141   :  { %957 = vmatprep.subr.bf16.mxu1 %v2607_v62  ;;  %1619 = vmatprep.subr.bf16.mxu0 %v2665_v20  ;;  %v2656_v62 = vld [vmem:[#allocation10 + $0xb0] ss:$20 sps:$4 sm:$0xff]   ;;  %v2696_v20 = vld [vmem:[#allocation13 + $0xb0] ss:$8 sps:$4 sm:$0xff]  }
 0x144   :  { %958 = vmatpush1.bf16.msra.mxu1 %v2605_v63  ;;  %v2657_v63 = vld [vmem:[#allocation10 + $0x218] ss:$20 sps:$4 sm:$0xff]  }
 0x145   :  { %959 = vmatprep.subr.bf16.mxu1 %v2613_v1  ;;  %v2675_v1 = vld [vmem:[#allocation13 + $0x40] ss:$8 sps:$4 sm:$0xff]  }
 0x148   :  { %960 = vmatpush1.bf16.msra.mxu1 %v2611_v2  ;;  %v2680_v2 = vld [vmem:[#allocation13 + $0x54] ss:$8 sps:$4 sm:$0xff]  }
 0x149   :  { %961 = vmatprep.subr.bf16.mxu1 %v2619_v3  ;;  %v2658_v3 = vld [vmem:[#allocation10 + $0xd8] ss:$20 sps:$4 sm:$0xff]  }
 0x14c   :  { %962 = vmatpush1.bf16.msra.mxu1 %v2617_v4  ;;  %v2659_v4 = vld [vmem:[#allocation10 + $0x240] ss:$20 sps:$4 sm:$0xff]  }
 0x14d   :  { %963 = vmatprep.subr.bf16.mxu1 %v2625_v5  ;;  %v2678_v5 = vld [vmem:[#allocation13 + $0x50] ss:$8 sps:$4 sm:$0xff]  }
 0x150   :  { %964 = vmatpush1.bf16.msra.mxu1 %v2623_v6  ;;  %v2683_v6 = vld [vmem:[#allocation13 + $0x64] ss:$8 sps:$4 sm:$0xff]  }
 0x151   :  { %965 = vmatprep.subr.bf16.mxu1 %v2631_v7  ;;  %v2660_v7 = vld [vmem:[#allocation10 + $0x100] ss:$20 sps:$4 sm:$0xff]  }
 0x154   :  { %966 = vmatpush1.bf16.msra.mxu1 %v2629_v8  ;;  %v2661_v8 = vld [vmem:[#allocation10 + $0x268] ss:$20 sps:$4 sm:$0xff]  }
 0x155   :  { %967 = vmatprep.subr.bf16.mxu1 %v2637_v11  ;;  %v2662_v11 = vld [vmem:[#allocation10 + $0x128] ss:$20 sps:$4 sm:$0xff]  }
 0x158   :  { %968 = vmatpush1.bf16.msra.mxu1 %v2635_v12  ;;  %v2684_v12 = vld [vmem:[#allocation13 + $0x70] ss:$8 sps:$4 sm:$0xff]  }
 0x159   :  { %969 = vmatprep.subr.bf16.mxu1 %v2643_v15  ;;  %v2692_v15 = vld [vmem:[#allocation13 + $0x94] ss:$8 sps:$4 sm:$0xff]  }
 0x15c   :  { %970 = vmatpush1.bf16.msra.mxu1 %v2641_v16  ;;  %v2690_v16 = vld [vmem:[#allocation13 + $0x90] ss:$8 sps:$4 sm:$0xff]  }
 0x15d   :  { %2400 = vmatprep.subr.bf16.mxu1 %v2647_v19  ;;  %v2698_v19 = vld [vmem:[#allocation13 + $0xb4] ss:$8 sps:$4 sm:$0xff]  }
 0x1f2   :  { %v377_v28 = vpop.f32.mrb[0].mxu1 }
 0x1f3   :  { %v378_v29 = vadd.f32 %v377_v28, %v250_v26  ;;  %v379_v30 = vpop.f32.mrb[1].mxu1  ;;  %v2707_v28 = vld [vmem:[#allocation13 + $0xe4] ss:$8 sps:$4 sm:$0xff]  }
 0x1f4   :  { %v380_v31 = vadd.f32 %v379_v30, %v254_v27  ;;  %v381_v32 = vpop.f32.mrb[2].mxu1  ;;  %v2710_v30 = vld [vmem:[#allocation13 + $0xf4] ss:$8 sps:$4 sm:$0xff]  }
 0x1f5   :  { %v390_v33 = vmul.f32 0.01, %v378_v29  ;;  %v382_v34 = vadd.f32 %v381_v32, %v250_v26  ;;  %v383_v35 = vpop.f32.mrb[3].mxu1  ;;  %vm386_vm0 = vcmp.gt.f32.partialorder %v378_v29, 0.0  ;;  %v2704_v26 = vld [vmem:[#allocation13 + $0xd4] ss:$8 sps:$4 sm:$0xff]  }
 0x1f6   :  { %v391_v36 = vmul.f32 0.01, %v380_v31  ;;  %v384_v37 = vadd.f32 %v383_v35, %v254_v27  ;;  %vm387_vm1 = vcmp.gt.f32.partialorder %v380_v31, 0.0  ;;  %v2702_v27 = vld [vmem:[#allocation13 + $0xd0] ss:$8 sps:$4 sm:$0xff]  }
 0x1f7   :  { %vm388_vm2 = vcmp.gt.f32.partialorder %v382_v34, 0.0  ;;  %v392_v38 = vmul.f32 0.01, %v382_v34  ;;  %v394_v40 = vsel %vm386_vm0, %v378_v29, %v390_v33  ;;  %v2705_v29 = vld [vmem:[#allocation13 + $0xe0] ss:$8 sps:$4 sm:$0xff]  }
 0x1f8   :  { %vm389_vm3 = vcmp.gt.f32.partialorder %v384_v37, 0.0  ;;  %v393_v39 = vmul.f32 0.01, %v384_v37  ;;  %v395_v43 = vsel %vm387_vm1, %v380_v31, %v391_v36  ;;  %v2708_v31 = vld [vmem:[#allocation13 + $0xf0] ss:$8 sps:$4 sm:$0xff]   ;;  %v2783_v33 = vld [vmem:[#allocation16 + $0x40] sm:$0xff]  }
 0x1f9   :  { %v396_v41 = vsel %vm388_vm2, %v382_v34, %v392_v38  ;;  %v2713_v32 = vld [vmem:[#allocation13 + $0x104] ss:$8 sps:$4 sm:$0xff]   ;;  %v508_v38 = vsub.s32 2, %v3465_v22  ;;  %vm3181_vm2 = vmmov 0  }
 0x1fa   :  { %v3475_v42 = vpack.c.bf16 %v396_v41, %v394_v40  ;;  %v397_v44 = vsel %vm389_vm3, %v384_v37, %v393_v39  ;;  %v2784_v34 = vld [vmem:[#allocation16] sm:$0xff]   ;;  %v2785_v35 = vld [vmem:[#allocation16 + $0x48] sm:$0xff]   ;;  %v2787_v37 = vld [vmem:[#allocation16 + $0x50] sm:$0xff]   ;;  %v512_v41 = vsub.s32 3, %v3465_v22 }
 0x1fb   :  { %v399_v45 = vpack.c.bf16 %v397_v44, %v395_v43  ;;  %v2786_v36 = vld [vmem:[#allocation16 + $0x8] sm:$0xff]   ;;  %v2788_v39 = vld [vmem:[#allocation16 + $0x10] sm:$0xff]   ;;  %v3481_v40 = vld [vmem:[#allocation11] sm:$0x1f] }
 0x1fc   :  { %v501_v43 = vrot.slane %v3481_v40, %v3468_v23  ;;  %v509_v44 = vrot.slane %v3481_v40, %v508_v38 }
 0x1fd   :  { %971 = vmatprep.mubr.bf16.mxu1 %v399_v45  ;;  %1014 = vmatprep.mubr.bf16.mxu0 %v399_v45 }
 0x1fe   :  { %972 = vmatmul.mubr.bf16.vlgmr.msra.gmra.mrb[4].mxu1 %v3475_v42  ;;  %1015 = vmatmul.mubr.bf16.vlgmr.msra.gmra.mrb[0].mxu0 %v3475_v42 }
 0x1ff   :  { %2401 = vmatpush3.bf16.msra.mxu1 %v2648_v46  ;;  %1057 = vmatprep.mubr.bf16.mxu1 %v399_v45  ;;  %v2790_v45 = vld [vmem:[#allocation16 + $0x18] sm:$0xff]   ;;  %v3487_v46 = vld [vmem:[#allocation5] sm:$0xff] }
 0x200   :  { %2402 = vmatprep.subr.bf16.mxu1 %v2649_v47  ;;  %1620 = vmatpush1.bf16.msra.mxu0 %v2663_v48  ;;  %v505_v47 = vrot.slane %v3481_v40, %v3471_v25  ;;  %v513_v48 = vrot.slane %v3481_v40, %v512_v41 }
 0x201   :  { %1621 = vmatprep.subr.bf16.mxu0 %v2668_v49  ;;  %v2791_v49 = vld [vmem:[#allocation16 + $0x60] sm:$0xff]  }
 0x203   :  { %2403 = vmatpush3.bf16.msra.mxu1 %v2650_v50  ;;  %v3492_v50 = vld [vmem:[#allocation5 + $0x8] sm:$0xff] }
 0x204   :  { %2404 = vmatprep.subr.bf16.mxu1 %v2651_v51  ;;  %1622 = vmatpush1.bf16.msra.mxu0 %v2666_v52  ;;  %v1099_v51 = vld [vmem:[#allocation5 + $0x14] sm:$0xff] }
 0x205   :  { %1623 = vmatprep.subr.bf16.mxu0 %v2671_v53 }
 0x207   :  { %2405 = vmatpush3.bf16.msra.mxu1 %v2652_v54 }
 0x208   :  { %2406 = vmatprep.subr.bf16.mxu1 %v2653_v55  ;;  %1624 = vmatpush1.bf16.msra.mxu0 %v2669_v56  ;;  %v1102_v55 = vunpack.c.l.bf16 %v3487_v46 }
 0x209   :  { %1625 = vmatprep.subr.bf16.mxu0 %v2674_v57 }
 0x20b   :  { %2407 = vmatpush3.bf16.msra.mxu1 %v2654_v58 }
 0x20c   :  { %2408 = vmatprep.subr.bf16.mxu1 %v2655_v59  ;;  %1626 = vmatpush1.bf16.msra.mxu0 %v2672_v60  ;;  %v1100_v59 = vld [vmem:[#allocation5 + $0x1c] sm:$0xff]  ;;  %v2792_v60 = vld [vmem:[#allocation16 + $0x20] sm:$0xff]  }
 0x20d   :  { %1627 = vmatprep.subr.bf16.mxu0 %v2677_v61  ;;  %v1104_v61 = vunpack.c.l.bf16 %v3492_v50 }
 0x20f   :  { %2409 = vmatpush3.bf16.msra.mxu1 %v2656_v62 }
 0x210   :  { %2410 = vmatprep.subr.bf16.mxu1 %v2657_v63  ;;  %1628 = vmatpush1.bf16.msra.mxu0 %v2675_v1 }
 0x211   :  { %1629 = vmatprep.subr.bf16.mxu0 %v2680_v2  ;;  %v1107_v2 = vunpack.c.l.bf16 %v1099_v51 }
 0x213   :  { %2411 = vmatpush3.bf16.msra.mxu1 %v2658_v3 }
 0x214   :  { %2412 = vmatprep.subr.bf16.mxu1 %v2659_v4  ;;  %1630 = vmatpush1.bf16.msra.mxu0 %v2678_v5 }
 0x215   :  { %1631 = vmatprep.subr.bf16.mxu0 %v2683_v6  ;;  %v1109_v6 = vunpack.c.l.bf16 %v1100_v59 }
 0x217   :  { %2413 = vmatpush3.bf16.msra.mxu1 %v2660_v7  ;;  %v1103_v7 = vunpack.c.h.bf16 %v3487_v46  ;;  %v2711_v46 = vld [vmem:[#allocation13 + $0x100] ss:$8 sps:$4 sm:$0xff]  }
 0x218   :  { %2414 = vmatprep.subr.bf16.mxu1 %v2661_v8  ;;  %1632 = vmatpush1.bf16.msra.mxu0 %v2681_v9  ;;  %v1108_v8 = vunpack.c.h.bf16 %v1099_v51  ;;  %v1105_v9 = vunpack.c.h.bf16 %v3492_v50  ;;  %v2719_v50 = vld [vmem:[#allocation13 + $0x124] ss:$8 sps:$4 sm:$0xff]   ;;  %v2717_v51 = vld [vmem:[#allocation13 + $0x120] ss:$8 sps:$4 sm:$0xff]  }
 0x219   :  { %1633 = vmatprep.subr.bf16.mxu0 %v2686_v10 }
 0x21b   :  { %2415 = vmatpush3.bf16.msra.mxu1 %v2662_v11 }
 0x21c   :  { %1634 = vmatpush1.bf16.msra.mxu0 %v2684_v12  ;;  %2422 = vmatprep.subr.bf16.mxu1 %v2783_v33 }
 0x21d   :  { %1635 = vmatprep.subr.bf16.mxu0 %v2689_v13 }
 0x21e   :  { %1058 = vmatmul.mubr.bf16.vlgmr.msra.gmra.mrb[8].mxu1 %v3475_v42  ;;  %v2789_v42 = vld [vmem:[#allocation16 + $0x58] sm:$0xff]  }
 0x21f   :  { %2423 = vmatpush3.bf16.msra.mxu1 %v2784_v34 }
 0x220   :  { %1636 = vmatpush1.bf16.msra.mxu0 %v2687_v14  ;;  %2424 = vmatprep.subr.bf16.mxu1 %v2785_v35 }
 0x221   :  { %1637 = vmatprep.subr.bf16.mxu0 %v2692_v15 }
 0x223   :  { %2425 = vmatpush3.bf16.msra.mxu1 %v2786_v36 }
 0x224   :  { %1638 = vmatpush1.bf16.msra.mxu0 %v2690_v16  ;;  %2426 = vmatprep.subr.bf16.mxu1 %v2787_v37 }
 0x225   :  { %1639 = vmatprep.subr.bf16.mxu0 %v2695_v17 }
 0x227   :  { %2427 = vmatpush3.bf16.msra.mxu1 %v2788_v39 }
 0x228   :  { %1640 = vmatpush1.bf16.msra.mxu0 %v2693_v18  ;;  %2428 = vmatprep.subr.bf16.mxu1 %v2789_v42  ;;  %v1110_v18 = vunpack.c.h.bf16 %v1100_v59  ;;  %v2728_v59 = vld [vmem:[#allocation13 + $0x154] ss:$8 sps:$4 sm:$0xff]  }
 0x229   :  { %1641 = vmatprep.subr.bf16.mxu0 %v2698_v19 }
 0x22b   :  { %2429 = vmatpush3.bf16.msra.mxu1 %v2790_v45 }
 0x22c   :  { %1642 = vmatpush1.bf16.msra.mxu0 %v2696_v20  ;;  %2430 = vmatprep.subr.bf16.mxu1 %v2791_v49  ;;  %v2714_v49 = vld [vmem:[#allocation13 + $0x110] ss:$8 sps:$4 sm:$0xff]  }
 0x22d   :  { %1643 = vmatprep.subr.bf16.mxu0 %v2701_v21 }
 0x22f   :  { %2431 = vmatpush3.bf16.msra.mxu1 %v2792_v60 }
 0x230   :  { %1644 = vmatpush1.bf16.msra.mxu0 %v2699_v24 }
 0x231   :  { %1645 = vmatprep.subr.bf16.mxu0 %v2704_v26 }
 0x234   :  { %1646 = vmatpush1.bf16.msra.mxu0 %v2702_v27 }
 0x235   :  { %1647 = vmatprep.subr.bf16.mxu0 %v2707_v28 }
 0x238   :  { %1648 = vmatpush1.bf16.msra.mxu0 %v2705_v29 }
 0x239   :  { %1649 = vmatprep.subr.bf16.mxu0 %v2710_v30 }
 0x23c   :  { %1650 = vmatpush1.bf16.msra.mxu0 %v2708_v31 }
 0x23d   :  { %1662 = vmatprep.subr.bf16.mxu0 %v2713_v32 }
 0x2d1   :  { %v973_v52 = vpop.f32.mrb[4].mxu1  ;;  %v1016_v53 = vpop.f32.mrb[0].mxu0 }
 0x2d2   :  { %v974_v54 = vadd.f32 %v973_v52, %v501_v43  ;;  %v1017_v56 = vadd.f32 %v1016_v53, %v509_v44  ;;  %v975_v57 = vpop.f32.mrb[5].mxu1  ;;  %v1018_v58 = vpop.f32.mrb[1].mxu0  ;;  %v2722_v52 = vld [vmem:[#allocation13 + $0x134] ss:$8 sps:$4 sm:$0xff]   ;;  %v2720_v53 = vld [vmem:[#allocation13 + $0x130] ss:$8 sps:$4 sm:$0xff]  }
 0x2d3   :  { %v976_v62 = vadd.f32 %v975_v57, %v505_v47  ;;  %v1019_v63 = vadd.f32 %v1018_v58, %v513_v48  ;;  %v977_v1 = vpop.f32.mrb[6].mxu1  ;;  %v1020_v3 = vpop.f32.mrb[2].mxu0 }
 0x2d4   :  { %vm1066_vm4 = vcmp.gt.f32.partialorder %v974_v54, 0.0  ;;  %v1076_v4 = vmul.f32 0.01, %v974_v54  ;;  %vm1068_vm5 = vcmp.gt.f32.partialorder %v1017_v56, 0.0  ;;  %v1078_v5 = vmul.f32 0.01, %v1017_v56 }
 0x2d5   :  { %v1077_v11 = vmul.f32 0.01, %v976_v62  ;;  %v978_v12 = vadd.f32 %v977_v1, %v501_v43  ;;  %v1021_v13 = vadd.f32 %v1020_v3, %v509_v44  ;;  %v979_v14 = vpop.f32.mrb[7].mxu1  ;;  %v1022_v15 = vpop.f32.mrb[3].mxu0  ;;  %vm1067_vm6 = vcmp.gt.f32.partialorder %v976_v62, 0.0 }
 0x2d6   :  { %v1086_v10 = vsel %vm1066_vm4, %v974_v54, %v1076_v4  ;;  %v1088_v16 = vsel %vm1068_vm5, %v1017_v56, %v1078_v5  ;;  %v1079_v17 = vmul.f32 0.01, %v1019_v63  ;;  %vm1069_vm9 = vcmp.gt.f32.partialorder %v1019_v63, 0.0  ;;  %v2725_v54 = vld [vmem:[#allocation13 + $0x144] ss:$8 sps:$4 sm:$0xff]  }
 0x2d7   :  { %vm1071_vm7 = vcmp.gt.f32.partialorder %v978_v12, 0.0  ;;  %v1081_v19 = vmul.f32 0.01, %v978_v12  ;;  %vm1073_vm8 = vcmp.gt.f32.partialorder %v1021_v13, 0.0  ;;  %v1083_v20 = vmul.f32 0.01, %v1021_v13 }
 0x2d8   :  { %v1112_v21 = vadd.f32 %v1102_v55, %v1086_v10  ;;  %v980_v24 = vadd.f32 %v979_v14, %v505_v47  ;;  %v1023_v26 = vadd.f32 %v1022_v15, %v513_v48  ;;  %v3498_v27 = vadd.f32 %v1104_v61, %v1088_v16  ;;  %v2716_v48 = vld [vmem:[#allocation13 + $0x114] ss:$8 sps:$4 sm:$0xff]   ;;  %v2723_v56 = vld [vmem:[#allocation13 + $0x140] ss:$8 sps:$4 sm:$0xff]   ;;  %v2731_v5 = vld [vmem:[#allocation13 + $0x164] ss:$8 sps:$4 sm:$0xff]  }
 0x2d9   :  { %v1087_v28 = vsel %vm1067_vm6, %v976_v62, %v1077_v11  ;;  %v1091_v29 = vsel %vm1071_vm7, %v978_v12, %v1081_v19  ;;  %v1093_v30 = vsel %vm1073_vm8, %v1021_v13, %v1083_v20  ;;  %v1089_v34 = vsel %vm1069_vm9, %v1019_v63, %v1079_v17  ;;  %v2726_v63 = vld [vmem:[#allocation13 + $0x150] ss:$8 sps:$4 sm:$0xff]   ;;  %v1098_v3 = vld [vmem:[#allocation5 + $0x10] ss:$20 sps:$4 sm:$0xff]   ;;  %v2737_v16 = vld [vmem:[#allocation13 + $0x184] ss:$8 sps:$4 sm:$0xff]  }
 0x2da   :  { %v1117_v31 = vadd.f32 %v1107_v2, %v1091_v29  ;;  %v3500_v32 = vadd.f32 %v1109_v6, %v1093_v30  ;;  %vm1072_vm10 = vcmp.gt.f32.partialorder %v980_v24, 0.0  ;;  %v1082_v33 = vmul.f32 0.01, %v980_v24  ;;  %v2734_v11 = vld [vmem:[#allocation13 + $0x174] ss:$8 sps:$4 sm:$0xff]  }
 0x2db   :  { %vm1074_vm11 = vcmp.gt.f32.partialorder %v1023_v26, 0.0  ;;  %v1084_v35 = vmul.f32 0.01, %v1023_v26  ;;  %v1113_v41 = vadd.f32 %v1103_v7, %v1087_v28  ;;  %v1115_v43 = vadd.f32 %v1105_v9, %v1089_v34  ;;  %v2729_v9 = vld [vmem:[#allocation13 + $0x160] ss:$8 sps:$4 sm:$0xff]  }
 0x2dc   :  { %v1092_v36 = vsel %vm1072_vm10, %v980_v24, %v1082_v33  ;;  %v1122_v37 = vpack.c.bf16 %v1117_v31, %v1112_v21  ;;  %v1124_v38 = vpack.c.bf16 %v3500_v32, %v3498_v27  ;;  %v516_v55 = vsub.s32 4, %v3465_v22  ;;  %v2732_v15 = vld [vmem:[#allocation13 + $0x170] ss:$8 sps:$4 sm:$0xff]   ;;  %v2740_v19 = vld [vmem:[#allocation13 + $0x194] ss:$8 sps:$4 sm:$0xff]  }
 0x2dd   :  { %v1094_v39 = vsel %vm1074_vm11, %v1023_v26, %v1084_v35  ;;  %v1118_v42 = vadd.f32 %v1108_v8, %v1092_v36  ;;  %v1106_v7 = vunpack.c.l.bf16 %v1098_v3  ;;  %v1111_v8 = vunpack.c.h.bf16 %v1098_v3  ;;  %v2738_v20 = vld [vmem:[#allocation13 + $0x190] ss:$8 sps:$4 sm:$0xff]   ;;  %v2743_v21 = vld [vmem:[#allocation13 + $0x1a4] ss:$8 sps:$4 sm:$0xff]   ;;  %v2741_v24 = vld [vmem:[#allocation13 + $0x1a0] ss:$8 sps:$4 sm:$0xff]  }
 0x2de   :  { %v1120_v44 = vadd.f32 %v1110_v18, %v1094_v39  ;;  %v517_v58 = vrot.slane %v3481_v40, %v516_v55  ;;  %v2735_v18 = vld [vmem:[#allocation13 + $0x180] ss:$8 sps:$4 sm:$0xff]   ;;  %v2746_v26 = vld [vmem:[#allocation13 + $0x1b4] ss:$8 sps:$4 sm:$0xff]   ;;  %v2744_v28 = vld [vmem:[#allocation13 + $0x1b0] ss:$8 sps:$4 sm:$0xff]  }
 0x2df   :  { %v1123_v45 = vpack.c.bf16 %v1118_v42, %v1113_v41  ;;  %v2749_v29 = vld [vmem:[#allocation13 + $0x1c4] ss:$8 sps:$4 sm:$0xff]   ;;  %v2747_v30 = vld [vmem:[#allocation13 + $0x1c0] ss:$8 sps:$4 sm:$0xff]   ;;  %v2752_v31 = vld [vmem:[#allocation13 + $0x1d4] ss:$8 sps:$4 sm:$0xff]  }
 0x2e0   :  { %v1125_v47 = vpack.c.bf16 %v1120_v44, %v1115_v43  ;;  %v2750_v33 = vld [vmem:[#allocation13 + $0x1d0] ss:$8 sps:$4 sm:$0xff]   ;;  %v2755_v34 = vld [vmem:[#allocation13 + $0x1e4] ss:$8 sps:$4 sm:$0xff]   ;;  %v2753_v35 = vld [vmem:[#allocation13 + $0x1e0] ss:$8 sps:$4 sm:$0xff]  }
 0x2e1   :  { %1651 = vmatprep.mubr.bf16.mxu0 %v1123_v45  ;;  %v2758_v36 = vld [vmem:[#allocation13 + $0x1f4] ss:$8 sps:$4 sm:$0xff]   ;;  %v2761_v39 = vld [vmem:[#allocation13 + $0x204] ss:$8 sps:$4 sm:$0xff]   ;;  %v2759_v41 = vld [vmem:[#allocation13 + $0x200] ss:$8 sps:$4 sm:$0xff]  }
 0x2e2   :  { %1652 = vmatmul.mubr.bf16.vlgmr.msra.gmra.mrb[4].mxu0 %v1122_v37  ;;  %v2756_v37 = vld [vmem:[#allocation13 + $0x1f0] ss:$8 sps:$4 sm:$0xff]   ;;  %v2764_v42 = vld [vmem:[#allocation13 + $0x214] ss:$8 sps:$4 sm:$0xff]   ;;  %v2767_v44 = vld [vmem:[#allocation13 + $0x224] ss:$8 sps:$4 sm:$0xff]  }
 0x2e3   :  { %1663 = vmatpush1.bf16.msra.mxu0 %v2711_v46  ;;  %1694 = vmatprep.mubr.bf16.mxu0 %v1125_v47  ;;  %v2762_v43 = vld [vmem:[#allocation13 + $0x210] ss:$8 sps:$4 sm:$0xff]   ;;  %v2765_v45 = vld [vmem:[#allocation13 + $0x220] ss:$8 sps:$4 sm:$0xff]   ;;  %v2770_v46 = vld [vmem:[#allocation13 + $0x234] ss:$8 sps:$4 sm:$0xff]  }
 0x2e4   :  { %1664 = vmatprep.subr.bf16.mxu0 %v2716_v48  ;;  %v2768_v47 = vld [vmem:[#allocation13 + $0x230] ss:$8 sps:$4 sm:$0xff]   ;;  %v2773_v48 = vld [vmem:[#allocation13 + $0x244] ss:$8 sps:$4 sm:$0xff]   ;;  %vm2103_vm7 = vcmask 523264  }
 0x2e5   :  { %v2774_v27 = vld [vmem:[#allocation13 + $0x250] ss:$8 sps:$4 sm:$0xff]   ;;  %v2779_v32 = vld [vmem:[#allocation13 + $0x264] ss:$8 sps:$4 sm:$0xff]  }
 0x2e6   :  { %v2796_v55 = vld [vmem:[#allocation16 + $0x30] sm:$0xff]  }
 0x2e7   :  { %1665 = vmatpush1.bf16.msra.mxu0 %v2714_v49  ;;  %v2771_v49 = vld [vmem:[#allocation13 + $0x240] ss:$8 sps:$4 sm:$0xff]  }
 0x2e8   :  { %1666 = vmatprep.subr.bf16.mxu0 %v2719_v50  ;;  %v2776_v50 = vld [vmem:[#allocation13 + $0x254] ss:$8 sps:$4 sm:$0xff]  }
 0x2eb   :  { %1667 = vmatpush1.bf16.msra.mxu0 %v2717_v51  ;;  %v2780_v51 = vld [vmem:[#allocation13 + $0x270] ss:$8 sps:$4 sm:$0xff]  }
 0x2ec   :  { %1668 = vmatprep.subr.bf16.mxu0 %v2722_v52  ;;  %v2793_v52 = vld [vmem:[#allocation16 + $0x68] sm:$0xff]  }
 0x2ed   :  { %2432 = vmatprep.subr.bf16.mxu1 %v2793_v52 }
 0x2ef   :  { %1669 = vmatpush1.bf16.msra.mxu0 %v2720_v53  ;;  %v2794_v53 = vld [vmem:[#allocation16 + $0x28] sm:$0xff]  }
 0x2f0   :  { %1670 = vmatprep.subr.bf16.mxu0 %v2725_v54  ;;  %2433 = vmatpush3.bf16.msra.mxu1 %v2794_v53  ;;  %v2795_v54 = vld [vmem:[#allocation16 + $0x70] sm:$0xff]  }
 0x2f1   :  { %v2416_v57 = vpop.f32.mrb[8].mxu1  ;;  %2434 = vmatprep.subr.bf16.mxu1 %v2795_v54  ;;  %v2385_v54 = vld [vmem:[#allocation23] ss:$0 sm:$0xff] }
 0x2f2   :  { %v2417_v60 = vpop.f32.mrb[9].mxu1 }
 0x2f3   :  { %v2418_v61 = vadd.f32 %v2417_v60, %v2416_v57  ;;  %v2419_v62 = vpop.f32.mrb[10].mxu1  ;;  %1671 = vmatpush1.bf16.msra.mxu0 %v2723_v56  ;;  %v2797_v56 = vld [vmem:[#allocation16 + $0x78] sm:$0xff]  }
 0x2f4   :  { %v2420_v1 = vpop.f32.mrb[11].mxu1  ;;  %1672 = vmatprep.subr.bf16.mxu0 %v2728_v59  ;;  %2435 = vmatpush3.bf16.msra.mxu1 %v2796_v55  ;;  %v2798_v57 = vld [vmem:[#allocation16 + $0x38] sm:$0xff]  }
 0x2f5   :  { %v1060_v2 = vadd.f32 %v2418_v61, %v517_v58  ;;  %v2421_v4 = vadd.f32 %v2420_v1, %v2419_v62  ;;  %2436 = vmatprep.subr.bf16.mxu1 %v2797_v56  ;;  %v1207_v59 = vld [vmem:[#allocation14] sm:$0x3] }
 0x2f6   :  { %v1212_v60 = vrot.slane %v1207_v59, %v3468_v23  ;;  %v1216_v61 = vrot.slane %v1207_v59, %v3471_v25 }
 0x2f7   :  { %vm1070_vm12 = vcmp.gt.f32.partialorder %v1060_v2, 0.0  ;;  %v1080_v22 = vmul.f32 0.01, %v1060_v2  ;;  %v1063_v6 = vadd.f32 %v2421_v4, %v517_v58  ;;  %1673 = vmatpush1.bf16.msra.mxu0 %v2726_v63  ;;  %v3180_v58 = vmov 0.0  }
 0x2f8   :  { %1674 = vmatprep.subr.bf16.mxu0 %v2731_v5  ;;  %2437 = vmatpush3.bf16.msra.mxu1 %v2798_v57 }
 0x2f9   :  { %v1090_v40 = vsel %vm1070_vm12, %v1060_v2, %v1080_v22  ;;  %vm1075_vm13 = vcmp.gt.f32.partialorder %v1063_v6, 0.0  ;;  %v1085_v10 = vmul.f32 0.01, %v1063_v6  ;;  %2458 = vmatprep.subr.bf16.mxu1 %v3180_v58 }
 0x2fa   :  { %v3506_v13 = vadd.f32 %v1106_v7, %v1090_v40 }
 0x2fb   :  { %v1095_v12 = vsel %vm1075_vm13, %v1063_v6, %v1085_v10  ;;  %1675 = vmatpush1.bf16.msra.mxu0 %v2729_v9 }
 0x2fc   :  { %v3508_v14 = vadd.f32 %v1111_v8, %v1095_v12  ;;  %1676 = vmatprep.subr.bf16.mxu0 %v2734_v11 }
 0x2fe   :  { %v1126_v17 = vpack.c.bf16 %v3508_v14, %v3506_v13  ;;  %v2799_v13 = vld [vmem:[#allocation19] sm:$0xff]   ;;  %v2800_v14 = vld [vmem:[#allocation19 + $0x8] sm:$0xff]  }
 0x2ff   :  { %1677 = vmatpush1.bf16.msra.mxu0 %v2732_v15  ;;  %v2801_v15 = vld [vmem:[#allocation19 + $0x10] sm:$0xff]  }
 0x300   :  { %1678 = vmatprep.subr.bf16.mxu0 %v2737_v16  ;;  %v2802_v16 = vld [vmem:[#allocation19 + $0x18] sm:$0xff]  }
 0x303   :  { %1679 = vmatpush1.bf16.msra.mxu0 %v2735_v18  ;;  %v2804_v18 = vld [vmem:[#allocation19 + $0x28] sm:$0xff]  }
 0x304   :  { %1680 = vmatprep.subr.bf16.mxu0 %v2740_v19  ;;  %v2805_v19 = vld [vmem:[#allocation19 + $0x30] sm:$0xff]  }
 0x307   :  { %1681 = vmatpush1.bf16.msra.mxu0 %v2738_v20  ;;  %v2806_v20 = vld [vmem:[#allocation19 + $0x38] sm:$0xff]  }
 0x308   :  { %1682 = vmatprep.subr.bf16.mxu0 %v2743_v21 }
 0x30b   :  { %1683 = vmatpush1.bf16.msra.mxu0 %v2741_v24  ;;  %v2359_v24 = vld [vmem:[#allocation17] ss:$0 sm:$0xff] }
 0x30c   :  { %1684 = vmatprep.subr.bf16.mxu0 %v2746_v26 }
 0x30f   :  { %1685 = vmatpush1.bf16.msra.mxu0 %v2744_v28 }
 0x310   :  { %1686 = vmatprep.subr.bf16.mxu0 %v2749_v29 }
 0x313   :  { %1687 = vmatpush1.bf16.msra.mxu0 %v2747_v30 }
 0x314   :  { %1688 = vmatprep.subr.bf16.mxu0 %v2752_v31 }
 0x317   :  { %1689 = vmatpush1.bf16.msra.mxu0 %v2750_v33 }
 0x318   :  { %1690 = vmatprep.subr.bf16.mxu0 %v2755_v34 }
 0x31b   :  { %1691 = vmatpush1.bf16.msra.mxu0 %v2753_v35 }
 0x31c   :  { %1692 = vmatprep.subr.bf16.mxu0 %v2758_v36 }
 0x31f   :  { %1693 = vmatpush1.bf16.msra.mxu0 %v2756_v37 }
 0x320   :  { %1705 = vmatprep.subr.bf16.mxu0 %v2761_v39 }
 0x322   :  { %1695 = vmatmul.mubr.bf16.vlgmr.msra.gmra.mrb[4].mxu0 %v1124_v38  ;;  %v2782_v38 = vld [vmem:[#allocation13 + $0x274] ss:$8 sps:$4 sm:$0xff]  }
 0x323   :  { %1706 = vmatpush1.bf16.msra.mxu0 %v2759_v41  ;;  %1737 = vmatprep.mubr.bf16.mxu0 %v3179_v0  ;;  %v2777_v0 = vld [vmem:[#allocation13 + $0x260] ss:$8 sps:$4 sm:$0xff]  }
 0x324   :  { %1707 = vmatprep.subr.bf16.mxu0 %v2764_v42  ;;  %v2807_v41 = vld [vmem:[#allocation22] sm:$0xff]  }
 0x327   :  { %1708 = vmatpush1.bf16.msra.mxu0 %v2762_v43  ;;  %v2808_v43 = vld [vmem:[#allocation22 + $0x8] sm:$0xff]  }
 0x328   :  { %1709 = vmatprep.subr.bf16.mxu0 %v2767_v44  ;;  %v2809_v44 = vld [vmem:[#allocation22 + $0x10] sm:$0xff]  }
 0x32b   :  { %1710 = vmatpush1.bf16.msra.mxu0 %v2765_v45  ;;  %v2810_v45 = vld [vmem:[#allocation22 + $0x18] sm:$0xff]  }
 0x32c   :  { %1711 = vmatprep.subr.bf16.mxu0 %v2770_v46  ;;  %v2376_v46 = vld [vmem:[#allocation20] ss:$0 sm:$0xff] }
 0x32f   :  { %1712 = vmatpush1.bf16.msra.mxu0 %v2768_v47 }
 0x330   :  { %1713 = vmatprep.subr.bf16.mxu0 %v2773_v48 }
 0x333   :  { %1714 = vmatpush1.bf16.msra.mxu0 %v2771_v49 }
 0x334   :  { %1715 = vmatprep.subr.bf16.mxu0 %v2776_v50 }
 0x337   :  { %1716 = vmatpush1.bf16.msra.mxu0 %v2774_v27 }
 0x338   :  { %1717 = vmatprep.subr.bf16.mxu0 %v2779_v32 }
 0x33b   :  { %1718 = vmatpush1.bf16.msra.mxu0 %v2777_v0 }
 0x33c   :  { %1719 = vmatprep.subr.bf16.mxu0 %v2782_v38 }
 0x33f   :  { %1720 = vmatpush1.bf16.msra.mxu0 %v2780_v51 }
 0x342   :  { %1738 = vmatmul.mubr.bf16.vlgmr.msra.gmra.mrb[4].mxu0 %v1126_v17  ;;  %v2803_v17 = vld [vmem:[#allocation19 + $0x20] sm:$0xff]  }
 0x415   :  { %v1739_v62 = vpop.f32.mrb[4].mxu0 }
 0x416   :  { %v2490_v63 = vadd.f32 %v1739_v62, %v1212_v60  ;;  %v1741_v1 = vpop.f32.mrb[5].mxu0 }
 0x417   :  { %v2491_v2 = vadd.f32 %v1741_v1, %v1216_v61  ;;  %v1743_v3 = vpop.f32.mrb[6].mxu0 }
 0x418   :  { %v1752_v4 = vmul.f32 0.01, %v2490_v63  ;;  %v2492_v5 = vadd.f32 %v1743_v3, %v1212_v60  ;;  %v1745_v22 = vpop.f32.mrb[7].mxu0  ;;  %vm1748_vm14 = vcmp.gt.f32.partialorder %v2490_v63, 0.0 }
 0x419   :  { %v1753_v6 = vmul.f32 0.01, %v2491_v2  ;;  %v2493_v7 = vadd.f32 %v1745_v22, %v1216_v61  ;;  %vm1749_vm15 = vcmp.gt.f32.partialorder %v2491_v2, 0.0 }
 0x41a   :  { %vm1750_vm0 = vcmp.gt.f32.partialorder %v2492_v5, 0.0  ;;  %v1754_v8 = vmul.f32 0.01, %v2492_v5  ;;  %v1756_v40 = vsel %vm1748_vm14, %v2490_v63, %v1752_v4 }
 0x41b   :  { %vm1751_vm1 = vcmp.gt.f32.partialorder %v2493_v7, 0.0  ;;  %v1755_v9 = vmul.f32 0.01, %v2493_v7  ;;  %v1757_v25 = vsel %vm1749_vm15, %v2491_v2, %v1753_v6 }
 0x41c   :  { %v1758_v23 = vsel %vm1750_vm0, %v2492_v5, %v1754_v8 }
 0x41d   :  { %v1760_v10 = vpack.c.bf16 %v1758_v23, %v1756_v40  ;;  %v1759_v11 = vsel %vm1751_vm1, %v2493_v7, %v1755_v9 }
 0x41e   :  { %v1761_v12 = vpack.c.bf16 %v1759_v11, %v1757_v25 }
 0x420   :  { %1929 = vmatprep.mubr.bf16.mxu1 %v1761_v12 }
 0x421   :  { %1930 = vmatmul.mubr.bf16.vlgmr.msra.gmra.mrb[12].mxu1 %v1760_v10 }
 0x422   :  { %2459 = vmatpush3.bf16.msra.mxu1 %v2799_v13  ;;  %2474 = vmatprep.mubr.msk.bf16.mxu1 %vm3181_vm2, %v3180_v58 }
 0x423   :  { %2460 = vmatprep.subr.bf16.mxu1 %v3180_v58 }
 0x426   :  { %2461 = vmatpush3.bf16.msra.mxu1 %v2800_v14 }
 0x427   :  { %2462 = vmatprep.subr.bf16.mxu1 %v3180_v58 }
 0x42a   :  { %2463 = vmatpush3.bf16.msra.mxu1 %v2801_v15 }
 0x42b   :  { %2464 = vmatprep.subr.bf16.mxu1 %v3180_v58 }
 0x42e   :  { %2465 = vmatpush3.bf16.msra.mxu1 %v2802_v16 }
 0x42f   :  { %2466 = vmatprep.subr.bf16.mxu1 %v3180_v58 }
 0x432   :  { %2467 = vmatpush3.bf16.msra.mxu1 %v2803_v17 }
 0x433   :  { %2468 = vmatprep.subr.bf16.mxu1 %v3180_v58 }
 0x436   :  { %2469 = vmatpush3.bf16.msra.mxu1 %v2804_v18 }
 0x437   :  { %2470 = vmatprep.subr.bf16.mxu1 %v3180_v58 }
 0x43a   :  { %2471 = vmatpush3.bf16.msra.mxu1 %v2805_v19 }
 0x43b   :  { %2472 = vmatprep.subr.bf16.mxu1 %v3180_v58 }
 0x43e   :  { %2473 = vmatpush3.bf16.msra.mxu1 %v2806_v20 }
 0x43f   :  { %2478 = vmatprep.subr.bf16.mxu1 %v3180_v58 }
 0x4f4   :  { %v2438_v21 = vpop.f32.mrb[12].mxu1 }
 0x4f5   :  { %v2439_v26 = vpop.f32.mrb[13].mxu1 }
 0x4f6   :  { %v2440_v28 = vadd.f32 %v2439_v26, %v2438_v21  ;;  %v2441_v29 = vpop.f32.mrb[14].mxu1 }
 0x4f7   :  { %v2442_v30 = vpop.f32.mrb[15].mxu1 }
 0x4f8   :  { %v1932_v31 = vadd.f32 %v2440_v28, %v2359_v24  ;;  %v2443_v33 = vadd.f32 %v2442_v30, %v2441_v29 }
 0x4fa   :  { %v1940_v34 = vmul.f32 0.01, %v1932_v31  ;;  %v1935_v35 = vadd.f32 %v2443_v33, %v2359_v24  ;;  %vm1938_vm3 = vcmp.gt.f32.partialorder %v1932_v31, 0.0 }
 0x4fc   :  { %vm1939_vm4 = vcmp.gt.f32.partialorder %v1935_v35, 0.0  ;;  %v1941_v36 = vmul.f32 0.01, %v1935_v35  ;;  %v1942_v37 = vsel %vm1938_vm3, %v1932_v31, %v1940_v34 }
 0x4fe   :  { %v1943_v39 = vsel %vm1939_vm4, %v1935_v35, %v1941_v36 }
 0x4ff   :  { %v1944_v42 = vpack.c.bf16 %v1943_v39, %v1942_v37 }
 0x501   :  { %2475 = vmatmul.mubr.bf16.vlgmr.msra.gmra.mrb[16].mxu1 %v1944_v42 }
 0x502   :  { %2479 = vmatpush3.bf16.msra.mxu1 %v2807_v41  ;;  %2486 = vmatprep.mubr.msk.bf16.mxu1 %vm3181_vm2, %v3180_v58 }
 0x503   :  { %2480 = vmatprep.subr.bf16.mxu1 %v3180_v58 }
 0x506   :  { %2481 = vmatpush3.bf16.msra.mxu1 %v2808_v43 }
 0x507   :  { %2482 = vmatprep.subr.bf16.mxu1 %v3180_v58 }
 0x50a   :  { %2483 = vmatpush3.bf16.msra.mxu1 %v2809_v44 }
 0x50b   :  { %2484 = vmatprep.subr.bf16.mxu1 %v3180_v58 }
 0x50e   :  { %2485 = vmatpush3.bf16.msra.mxu1 %v2810_v45 }
 0x5d4   :  { %v2050_v47 = vpop.f32.mrb[16].mxu1 }
 0x5d5   :  { %v2051_v48 = vadd.f32 %v2376_v46, %v2050_v47  ;;  %v2476_v49 = vpop.f32.mrb[17].mxu1 }
 0x5d6   :  { %v2053_v50 = vpop.f32.mrb[18].mxu1 }
 0x5d7   :  { %v2059_v27 = vmul.f32 0.01, %v2051_v48  ;;  %v2054_v32 = vadd.f32 %v2376_v46, %v2053_v50  ;;  %v2477_v0 = vpop.f32.mrb[19].mxu1  ;;  %vm2057_vm5 = vcmp.gt.f32.partialorder %v2051_v48, 0.0 }
 0x5d9   :  { %vm2058_vm6 = vcmp.gt.f32.partialorder %v2054_v32, 0.0  ;;  %v2060_v38 = vmul.f32 0.01, %v2054_v32  ;;  %v2061_v51 = vsel %vm2057_vm5, %v2051_v48, %v2059_v27 }
 0x5db   :  { %v2062_v52 = vsel %vm2058_vm6, %v2054_v32, %v2060_v38 }
 0x5dc   :  { %v2063_v53 = vpack.c.bf16 %v2062_v52, %v2061_v51 }
 0x5de   :  { %2487 = vmatmul.mubr.msk.bf16.vlgmr.msra.gmra.mrb[20].mxu1 %vm2103_vm7, %v2063_v53 }
 0x6b1   :  { %v2141_v55 = vpop.f32.mrb[20].mxu1 }
 0x6b2   :  { %v2488_v56 = vpop.f32.mrb[21].mxu1  ;;  %v2142_v58 = vadd.f32 %v2385_v54, %v2141_v55 }
 0x6b3   :  { %v2144_v57 = vpop.f32.mrb[22].mxu1 }
 0x6b4   :  { %v2145_v59 = vadd.f32 %v2385_v54, %v2144_v57  ;;  %v2489_v60 = vpop.f32.mrb[23].mxu1 }
 0x6b6   :  { %v2398_v61 = vpack.c.bf16 %v2145_v59, %v2142_v58 }
 0x6b8   :  { %2399 = vst [vmem:[#allocation25] sm:$0xff] %v2398_v61  }
 0x6b9   :  { %3130 = shalt.err (!%p3127_p4)
}
 0x6ba   :  { %s3131_s15 = scalar_lea.hbm %s3566_s14, 128 }
 0x6bb   :  { %p3132_p5 = scmp.ne.s32.totalorder %s3566_s14, %s3131_s15  ;;  %p3135_p6 = scmp.lt.u32.totalorder %s3131_s15, %s3566_s14 }
 0x6bd   :  { %p3137_p7 = pnand %p3135_p6, %p3132_p5 }
 0x6bf   :  { %3140 = shalt.err (!%p3137_p7)
}
 0x6c0   :  { %2169 = dma.vmem_to_hbm [thread:$0]  %s2164_s8, 128, %s3566_s14, [#allocation4], %s3168_s11, %s3168_s11, %s3169_s18  }
 0x6c1   :  { %3157 = dma.done.wait [#allocation4], 128  }
 0x6c2   :  { %3158 = vsyncadd [#allocation4], 4294967168 }
 0x6c3   :  { %2173 = vsyncpa [#allocation3], 1 }
 0x6c4   :  { %2174 = vsyncpa [#allocation6], 1 }
 0x6c5   :  { %2175 = vsyncpa [#allocation9], 1 }
 0x6c6   :  { %2176 = vsyncpa [#allocation12], 1 }
 0x6c7   :  { %2177 = vsyncpa [#allocation15], 1 }
 0x6c8   :  { %2178 = vsyncpa [#allocation18], 1 }
 0x6c9   :  { %2179 = vsyncpa [#allocation21], 1 }
 0x6ca   :  { %2180 = vsyncpa [#allocation24], 1 }
 0x6cb   :  { %2181 = vsyncpa [#allocation4], 1 }

</bundles_post_ra>
